<compile_context>
chip_gen: v7x
topology: tpu7x:2x2x1
jax: 0.10.0
libtpu: 0.0.40
codegen_flags: <defaults>
</compile_context>

<pallas_src>
import math

import jax
import jax.numpy as jnp
from jax import lax
from jax.experimental import pallas as pl
from jax.experimental.pallas import tpu as pltpu

# ----------------------------- tiny BERT config ------------------------------
VOCAB = 30
HIDDEN = 32
NUM_LAYERS = 2
NUM_HEADS = 2
HEAD_DIM = HIDDEN // NUM_HEADS
INTERMEDIATE = 64
MAX_POS = 16
LN_EPS = 1e-12

BATCH = 2
SEQ = 8           # power of two (see position-id bitmask below)
BS = BATCH * SEQ

assert SEQ & (SEQ - 1) == 0, "SEQ must be a power of two for the bitmask trick"


# --------------------------------- helpers -----------------------------------
def _layer_norm(x, gamma, beta):
    mu = jnp.mean(x, axis=-1, keepdims=True)
    var = jnp.mean((x - mu) ** 2, axis=-1, keepdims=True)
    return (x - mu) * lax.rsqrt(var + LN_EPS) * gamma + beta


def _gelu(x):
    # TODO(synk): tanh-approx GELU ("gelu_new"); HF exact erf-GELU differs <1e-3.
    c = math.sqrt(2.0 / math.pi)
    return 0.5 * x * (1.0 + jnp.tanh(c * (x + 0.044715 * x * x * x)))


# ------------------------------ fused kernel ----------------------------------
def fused_bert_kernel(ids_ref, mask_ref,
                      wemb_ref, pemb_ref, temb_ref, eg_ref, eb_ref,
                      wqkv_ref, bqkv_ref, wo_ref, bo_ref,
                      ln1g_ref, ln1b_ref, w1_ref, b1_ref, w2_ref, b2_ref,
                      ln2g_ref, ln2b_ref, wp_ref, bp_ref,
                      out_ref):
    f32 = jnp.float32

    # ---- embeddings: one-hot gathers on the MXU (no HBM round-trip) ----
    ids = ids_ref[...]                                             # (BS, 1) int32
    vcol = lax.broadcasted_iota(jnp.int32, (BS, VOCAB), 1)
    tok_oh = (vcol == ids).astype(f32)                             # (BS, VOCAB)
    tok = jnp.dot(tok_oh, wemb_ref[...], preferred_element_type=f32)   # (BS, H)

    prow = lax.broadcasted_iota(jnp.int32, (BS, MAX_POS), 0)
    pcol = lax.broadcasted_iota(jnp.int32, (BS, MAX_POS), 1)
    pos_id = jnp.bitwise_and(prow, SEQ - 1)                        # row % SEQ
    pos_oh = (pcol == pos_id).astype(f32)                          # (BS, MAX_POS)
    pos = jnp.dot(pos_oh, pemb_ref[...], preferred_element_type=f32)   # (BS, H)

    emb = tok + pos + temb_ref[0:1, :]                             # type id 0
    x = _layer_norm(emb, eg_ref[...], eb_ref[...])                 # (BS, H)

    # additive attention-mask bias, built in-kernel from attention_mask
    mask_f = mask_ref[...].astype(f32)                             # (B, 1, S)
    bias = (1.0 - mask_f) * -10000.0                               # (B, 1, S)

    scale = 1.0 / math.sqrt(HEAD_DIM)

    # ---- encoder layers (static unrolled loop; weights stacked along L) ----
    for li in range(NUM_LAYERS):
        wqkv = wqkv_ref[li]                                        # (H, 3H)
        bqkv = bqkv_ref[li]                                        # (1, 3H)
        wo = wo_ref[li]                                            # (H, H)
        bo = bo_ref[li]                                            # (1, H)

        # fused QKV projection: one MXU pass over the whole (B*S, H) batch
        qkv = jnp.dot(x, wqkv, preferred_element_type=f32) + bqkv  # (BS, 3H)

        attn = jnp.zeros((BS, HIDDEN), f32)
        for h in range(NUM_HEADS):                                 # static loop
            lo = h * HEAD_DIM
            qh = qkv[:, lo:lo + HEAD_DIM].reshape(BATCH, SEQ, HEAD_DIM)
            kh = qkv[:, HIDDEN + lo:HIDDEN + lo + HEAD_DIM].reshape(
                BATCH, SEQ, HEAD_DIM)
            vh = qkv[:, 2 * HIDDEN + lo:2 * HIDDEN + lo + HEAD_DIM].reshape(
                BATCH, SEQ, HEAD_DIM)

            s = jnp.einsum('bqd,bkd->bqk', qh, kh,
                           preferred_element_type=f32) * scale
            s = s + bias                                           # (B, S, S)
            m = jnp.max(s, axis=-1, keepdims=True)
            p = jnp.exp(s - m)
            l = jnp.sum(p, axis=-1, keepdims=True)
            probs = p * pl.reciprocal(l, approx=True)              # EUP, not VPU

            ctxh = jnp.einsum('bqk,bkd->bqd', probs, vh,
                              preferred_element_type=f32).reshape(BS, HEAD_DIM)
            # sum_h ctx_h @ Wo[rows of head h]  ==  concat(ctx) @ Wo
            attn = attn + jnp.dot(ctxh, wo[lo:lo + HEAD_DIM, :],
                                  preferred_element_type=f32)
        attn = attn + bo

        h1 = _layer_norm(x + attn, ln1g_ref[li], ln1b_ref[li])

        ff = _gelu(jnp.dot(h1, w1_ref[li],
                           preferred_element_type=f32) + b1_ref[li])
        ff = jnp.dot(ff, w2_ref[li],
                     preferred_element_type=f32) + b2_ref[li]
        x = _layer_norm(h1 + ff, ln2g_ref[li], ln2b_ref[li])

    # ---- pooler: pick [CLS] row of each sequence via one-hot matmul, then
    #      tanh(cls @ Wp + bp).  One unmasked, lane-dense store of out_ref. ----
    srow = lax.broadcasted_iota(jnp.int32, (BATCH, BS), 0)
    scol = lax.broadcasted_iota(jnp.int32, (BATCH, BS), 1)
    sel = (scol == srow * SEQ).astype(f32)                         # (B, BS)
    cls = jnp.dot(sel, x, preferred_element_type=f32)              # (B, H)
    out_ref[...] = jnp.tanh(
        jnp.dot(cls, wp_ref[...], preferred_element_type=f32) + bp_ref[...])


# ------------------------------ pallas wrapper ---------------------------------
def peptide_bert_forward(params, input_ids, attention_mask):
    B, S = input_ids.shape
    ids2 = input_ids.reshape(B * S, 1).astype(jnp.int32)           # layout glue only
    mask3 = attention_mask.reshape(B, 1, S).astype(jnp.int32)

    vmem = pl.BlockSpec(memory_space=pltpu.MemorySpace.VMEM)       # whole-array, VMEM-resident
    return pl.pallas_call(
        fused_bert_kernel,
        out_shape=jax.ShapeDtypeStruct((B, HIDDEN), jnp.float32),
        in_specs=[vmem] * 21,
        out_specs=vmem,
    )(ids2, mask3,
      params["word_emb"], params["pos_emb"], params["type_emb"],
      params["emb_ln_g"], params["emb_ln_b"],
      params["wqkv"], params["bqkv"], params["wo"], params["bo"],
      params["ln1_g"], params["ln1_b"], params["w1"], params["b1"],
      params["w2"], params["b2"], params["ln2_g"], params["ln2_b"],
      params["pooler_w"], params["pooler_b"])


# ------------------------------ parameter setup --------------------------------
def init_params(key):
    def nrm(k, shape):
        return (0.02 * jax.random.normal(k, shape)).astype(jnp.float32)

    L, H, I = NUM_LAYERS, HIDDEN, INTERMEDIATE
    keys = jax.random.split(key, 4 + NUM_LAYERS)
    wqkv, wo, w1, w2 = [], [], [], []
    for li in range(NUM_LAYERS):
        lk = jax.random.split(keys[4 + li], 4)
        wqkv.append(nrm(lk[0], (H, 3 * H)))   # fused [Wq | Wk | Wv], stored (in, out)
        wo.append(nrm(lk[1], (H, H)))
        w1.append(nrm(lk[2], (H, I)))
        w2.append(nrm(lk[3], (I, H)))

    return {
        "word_emb": nrm(keys[0], (VOCAB, H)),
        "pos_emb": nrm(keys[1], (MAX_POS, H)),
        "type_emb": nrm(keys[2], (2, H)),
        "emb_ln_g": jnp.ones((1, H), jnp.float32),
        "emb_ln_b": jnp.zeros((1, H), jnp.float32),
        "pooler_w": nrm(keys[3], (H, H)),
        "pooler_b": jnp.zeros((1, H), jnp.float32),
        # per-layer weights stacked along a leading L axis (one VMEM-resident ref each)
        "wqkv": jnp.stack(wqkv), "bqkv": jnp.zeros((L, 1, 3 * H), jnp.float32),
        "wo": jnp.stack(wo), "bo": jnp.zeros((L, 1, H), jnp.float32),
        "ln1_g": jnp.ones((L, 1, H), jnp.float32),
        "ln1_b": jnp.zeros((L, 1, H), jnp.float32),
        "w1": jnp.stack(w1), "b1": jnp.zeros((L, 1, I), jnp.float32),
        "w2": jnp.stack(w2), "b2": jnp.zeros((L, 1, H), jnp.float32),
        "ln2_g": jnp.ones((L, 1, H), jnp.float32),
        "ln2_b": jnp.zeros((L, 1, H), jnp.float32),
    }


# ----------------------------------- main ---------------------------------------
if __name__ == "__main__":
    key = jax.random.PRNGKey(0)
    pkey, dkey = jax.random.split(key)
    params = init_params(pkey)

    input_ids = jax.random.randint(dkey, (BATCH, SEQ), 0, VOCAB, dtype=jnp.int32)
    attention_mask = jnp.ones((BATCH, SEQ), jnp.int32).at[1, SEQ - 2:].set(0)

    out = peptide_bert_forward(params, input_ids, attention_mask)
    out = jax.block_until_ready(out)
    assert out.shape == (BATCH, HIDDEN) and out.dtype == jnp.float32
    assert bool(jnp.all(jnp.isfinite(out)))
    print("KERNEL_OK")
</pallas_src>

<mosaic_0001>
module attributes {stable_mosaic.version = 11 : i64} {
  func.func @fused_bert_kernel(%arg0: memref<16x1xi32, #tpu.memory_space<vmem>>, %arg1: memref<2x1x8xi32, #tpu.memory_space<vmem>>, %arg2: memref<30x32xf32, #tpu.memory_space<vmem>>, %arg3: memref<16x32xf32, #tpu.memory_space<vmem>>, %arg4: memref<2x32xf32, #tpu.memory_space<vmem>>, %arg5: memref<1x32xf32, #tpu.memory_space<vmem>>, %arg6: memref<1x32xf32, #tpu.memory_space<vmem>>, %arg7: memref<2x32x96xf32, #tpu.memory_space<vmem>>, %arg8: memref<2x1x96xf32, #tpu.memory_space<vmem>>, %arg9: memref<2x32x32xf32, #tpu.memory_space<vmem>>, %arg10: memref<2x1x32xf32, #tpu.memory_space<vmem>>, %arg11: memref<2x1x32xf32, #tpu.memory_space<vmem>>, %arg12: memref<2x1x32xf32, #tpu.memory_space<vmem>>, %arg13: memref<2x32x64xf32, #tpu.memory_space<vmem>>, %arg14: memref<2x1x64xf32, #tpu.memory_space<vmem>>, %arg15: memref<2x64x32xf32, #tpu.memory_space<vmem>>, %arg16: memref<2x1x32xf32, #tpu.memory_space<vmem>>, %arg17: memref<2x1x32xf32, #tpu.memory_space<vmem>>, %arg18: memref<2x1x32xf32, #tpu.memory_space<vmem>>, %arg19: memref<32x32xf32, #tpu.memory_space<vmem>>, %arg20: memref<1x32xf32, #tpu.memory_space<vmem>>, %arg21: memref<2x32xf32, #tpu.memory_space<vmem>>) attributes {dimension_semantics = [], scalar_prefetch = 0 : i64, scratch_operands = 0 : i64, tpu.core_type = #tpu.core_type<tc>} {
    %c0 = arith.constant 0 : index
    %c0_0 = arith.constant 0 : index
    %0 = vector.load %arg0[%c0, %c0_0] : memref<16x1xi32, #tpu.memory_space<vmem>>, vector<16x1xi32>
    %1 = tpu.iota {dimensions = array<i32: 1>} : vector<16x30xi32>
    %2 = vector.broadcast %0 : vector<16x1xi32> to vector<16x30xi32>
    %3 = arith.cmpi eq, %1, %2 : vector<16x30xi32>
    %4 = arith.extui %3 : vector<16x30xi1> to vector<16x30xi32>
    %5 = arith.sitofp %4 : vector<16x30xi32> to vector<16x30xf32>
    %c0_1 = arith.constant 0 : index
    %c0_2 = arith.constant 0 : index
    %6 = vector.load %arg2[%c0_1, %c0_2] : memref<30x32xf32, #tpu.memory_space<vmem>>, vector<30x32xf32>
    %cst = arith.constant dense<0.000000e+00> : vector<16x32xf32>
    %7 = tpu.matmul %5, %6, %cst {dimension_numbers = #tpu.dot_dimension_numbers<[1], [0], [0], [1], [0, 0, 1, 1], [], []>} : vector<16x30xf32>, vector<30x32xf32>, vector<16x32xf32> -> vector<16x32xf32>
    %8 = tpu.iota {dimensions = array<i32: 0>} : vector<16x16xi32>
    %9 = tpu.iota {dimensions = array<i32: 1>} : vector<16x16xi32>
    %c7_i32 = arith.constant 7 : i32
    %10 = vector.broadcast %c7_i32 : i32 to vector<16x16xi32>
    %11 = arith.andi %8, %10 : vector<16x16xi32>
    %12 = arith.cmpi eq, %9, %11 : vector<16x16xi32>
    %13 = arith.extui %12 : vector<16x16xi1> to vector<16x16xi32>
    %14 = arith.sitofp %13 : vector<16x16xi32> to vector<16x16xf32>
    %c0_3 = arith.constant 0 : index
    %c0_4 = arith.constant 0 : index
    %15 = vector.load %arg3[%c0_3, %c0_4] : memref<16x32xf32, #tpu.memory_space<vmem>>, vector<16x32xf32>
    %cst_5 = arith.constant dense<0.000000e+00> : vector<16x32xf32>
    %16 = tpu.matmul %14, %15, %cst_5 {dimension_numbers = #tpu.dot_dimension_numbers<[1], [0], [0], [1], [0, 0, 1, 1], [], []>} : vector<16x16xf32>, vector<16x32xf32>, vector<16x32xf32> -> vector<16x32xf32>
    %17 = arith.addf %7, %16 : vector<16x32xf32>
    %c0_6 = arith.constant 0 : index
    %c0_7 = arith.constant 0 : index
    %18 = vector.load %arg4[%c0_6, %c0_7] : memref<2x32xf32, #tpu.memory_space<vmem>>, vector<1x32xf32>
    %19 = vector.broadcast %18 : vector<1x32xf32> to vector<16x32xf32>
    %20 = arith.addf %17, %19 : vector<16x32xf32>
    %c0_8 = arith.constant 0 : index
    %c0_9 = arith.constant 0 : index
    %21 = vector.load %arg5[%c0_8, %c0_9] : memref<1x32xf32, #tpu.memory_space<vmem>>, vector<1x32xf32>
    %c0_10 = arith.constant 0 : index
    %c0_11 = arith.constant 0 : index
    %22 = vector.load %arg6[%c0_10, %c0_11] : memref<1x32xf32, #tpu.memory_space<vmem>>, vector<1x32xf32>
    %cst_12 = arith.constant dense<0.000000e+00> : vector<16xf32>
    %23 = vector.multi_reduction <add>, %20, %cst_12 [1] : vector<16x32xf32> to vector<16xf32>
    %24 = vector.shape_cast %23 : vector<16xf32> to vector<16x1xf32>
    %cst_13 = arith.constant 3.200000e+01 : f32
    %25 = vector.broadcast %cst_13 : f32 to vector<16x1xf32>
    %26 = arith.divf %24, %25 : vector<16x1xf32>
    %27 = vector.broadcast %26 : vector<16x1xf32> to vector<16x32xf32>
    %28 = arith.subf %20, %27 : vector<16x32xf32>
    %29 = arith.mulf %28, %28 : vector<16x32xf32>
    %cst_14 = arith.constant dense<0.000000e+00> : vector<16xf32>
    %30 = vector.multi_reduction <add>, %29, %cst_14 [1] : vector<16x32xf32> to vector<16xf32>
    %31 = vector.shape_cast %30 : vector<16xf32> to vector<16x1xf32>
    %cst_15 = arith.constant 3.200000e+01 : f32
    %32 = vector.broadcast %cst_15 : f32 to vector<16x1xf32>
    %33 = arith.divf %31, %32 : vector<16x1xf32>
    %34 = vector.broadcast %26 : vector<16x1xf32> to vector<16x32xf32>
    %35 = arith.subf %20, %34 : vector<16x32xf32>
    %cst_16 = arith.constant 9.99999996E-13 : f32
    %36 = vector.broadcast %cst_16 : f32 to vector<16x1xf32>
    %37 = arith.addf %33, %36 : vector<16x1xf32>
    %38 = math.rsqrt %37 : vector<16x1xf32>
    %39 = vector.broadcast %38 : vector<16x1xf32> to vector<16x32xf32>
    %40 = arith.mulf %35, %39 : vector<16x32xf32>
    %41 = vector.broadcast %21 : vector<1x32xf32> to vector<16x32xf32>
    %42 = arith.mulf %40, %41 : vector<16x32xf32>
    %43 = vector.broadcast %22 : vector<1x32xf32> to vector<16x32xf32>
    %44 = arith.addf %42, %43 : vector<16x32xf32>
    %c0_17 = arith.constant 0 : index
    %c0_18 = arith.constant 0 : index
    %c0_19 = arith.constant 0 : index
    %45 = vector.load %arg1[%c0_17, %c0_18, %c0_19] : memref<2x1x8xi32, #tpu.memory_space<vmem>>, vector<2x1x8xi32>
    %46 = arith.sitofp %45 : vector<2x1x8xi32> to vector<2x1x8xf32>
    %cst_20 = arith.constant 1.000000e+00 : f32
    %47 = vector.broadcast %cst_20 : f32 to vector<2x1x8xf32>
    %48 = arith.subf %47, %46 : vector<2x1x8xf32>
    %cst_21 = arith.constant -1.000000e+04 : f32
    %49 = vector.broadcast %cst_21 : f32 to vector<2x1x8xf32>
    %50 = arith.mulf %48, %49 : vector<2x1x8xf32>
    %c0_22 = arith.constant 0 : index
    %c0_23 = arith.constant 0 : index
    %c0_24 = arith.constant 0 : index
    %51 = vector.load %arg7[%c0_22, %c0_23, %c0_24] : memref<2x32x96xf32, #tpu.memory_space<vmem>>, vector<1x32x96xf32>
    %52 = vector.shape_cast %51 : vector<1x32x96xf32> to vector<32x96xf32>
    %c0_25 = arith.constant 0 : index
    %c0_26 = arith.constant 0 : index
    %c0_27 = arith.constant 0 : index
    %53 = vector.load %arg8[%c0_25, %c0_26, %c0_27] : memref<2x1x96xf32, #tpu.memory_space<vmem>>, vector<1x1x96xf32>
    %54 = vector.shape_cast %53 : vector<1x1x96xf32> to vector<1x96xf32>
    %c0_28 = arith.constant 0 : index
    %c0_29 = arith.constant 0 : index
    %c0_30 = arith.constant 0 : index
    %55 = vector.load %arg9[%c0_28, %c0_29, %c0_30] : memref<2x32x32xf32, #tpu.memory_space<vmem>>, vector<1x32x32xf32>
    %56 = vector.shape_cast %55 : vector<1x32x32xf32> to vector<32x32xf32>
    %c0_31 = arith.constant 0 : index
    %c0_32 = arith.constant 0 : index
    %c0_33 = arith.constant 0 : index
    %57 = vector.load %arg10[%c0_31, %c0_32, %c0_33] : memref<2x1x32xf32, #tpu.memory_space<vmem>>, vector<1x1x32xf32>
    %58 = vector.shape_cast %57 : vector<1x1x32xf32> to vector<1x32xf32>
    %cst_34 = arith.constant dense<0.000000e+00> : vector<16x96xf32>
    %59 = tpu.matmul %44, %52, %cst_34 {dimension_numbers = #tpu.dot_dimension_numbers<[1], [0], [0], [1], [0, 0, 1, 1], [], []>} : vector<16x32xf32>, vector<32x96xf32>, vector<16x96xf32> -> vector<16x96xf32>
    %60 = vector.broadcast %54 : vector<1x96xf32> to vector<16x96xf32>
    %61 = arith.addf %59, %60 : vector<16x96xf32>
    %cst_35 = arith.constant 0.000000e+00 : f32
    %62 = vector.broadcast %cst_35 : f32 to vector<16x32xf32>
    %63 = vector.extract_strided_slice %61 {offsets = [0, 0], sizes = [16, 16], strides = [1, 1]} : vector<16x96xf32> to vector<16x16xf32>
    %64 = vector.shape_cast %63 : vector<16x16xf32> to vector<2x8x16xf32>
    %65 = vector.extract_strided_slice %61 {offsets = [0, 32], sizes = [16, 16], strides = [1, 1]} : vector<16x96xf32> to vector<16x16xf32>
    %66 = vector.shape_cast %65 : vector<16x16xf32> to vector<2x8x16xf32>
    %67 = vector.extract_strided_slice %61 {offsets = [0, 64], sizes = [16, 16], strides = [1, 1]} : vector<16x96xf32> to vector<16x16xf32>
    %68 = vector.shape_cast %67 : vector<16x16xf32> to vector<2x8x16xf32>
    "tpu.trace_start"() <{level = 10 : i32, message = "bqd,bkd->bqk"}> : () -> ()
    %cst_36 = arith.constant dense<0.000000e+00> : vector<2x8x8xf32>
    %69 = tpu.matmul %64, %66, %cst_36 {dimension_numbers = #tpu.dot_dimension_numbers<[2], [2], [1], [1], [0, 0, 0, 1, 1, 1], [0], [0]>} : vector<2x8x16xf32>, vector<2x8x16xf32>, vector<2x8x8xf32> -> vector<2x8x8xf32>
    "tpu.trace_stop"() : () -> ()
    %cst_37 = arith.constant 2.500000e-01 : f32
    %70 = vector.broadcast %cst_37 : f32 to vector<2x8x8xf32>
    %71 = arith.mulf %69, %70 : vector<2x8x8xf32>
    %72 = vector.broadcast %50 : vector<2x1x8xf32> to vector<2x8x8xf32>
    %73 = arith.addf %71, %72 : vector<2x8x8xf32>
    %cst_38 = arith.constant dense<0xFF800000> : vector<2x8xf32>
    %74 = vector.multi_reduction <maximumf>, %73, %cst_38 [2] : vector<2x8x8xf32> to vector<2x8xf32>
    %75 = vector.shape_cast %74 : vector<2x8xf32> to vector<2x8x1xf32>
    %76 = vector.broadcast %75 : vector<2x8x1xf32> to vector<2x8x8xf32>
    %77 = arith.subf %73, %76 : vector<2x8x8xf32>
    %78 = math.exp %77 : vector<2x8x8xf32>
    %cst_39 = arith.constant dense<0.000000e+00> : vector<2x8xf32>
    %79 = vector.multi_reduction <add>, %78, %cst_39 [2] : vector<2x8x8xf32> to vector<2x8xf32>
    %80 = vector.shape_cast %79 : vector<2x8xf32> to vector<2x8x1xf32>
    %81 = tpu.reciprocal %80 {approx = true} : vector<2x8x1xf32> -> vector<2x8x1xf32>
    %82 = vector.broadcast %81 : vector<2x8x1xf32> to vector<2x8x8xf32>
    %83 = arith.mulf %78, %82 : vector<2x8x8xf32>
    "tpu.trace_start"() <{level = 10 : i32, message = "bqk,bkd->bqd"}> : () -> ()
    %cst_40 = arith.constant dense<0.000000e+00> : vector<2x8x16xf32>
    %84 = tpu.matmul %83, %68, %cst_40 {dimension_numbers = #tpu.dot_dimension_numbers<[2], [1], [1], [2], [0, 0, 0, 1, 1, 2], [0], [0]>} : vector<2x8x8xf32>, vector<2x8x16xf32>, vector<2x8x16xf32> -> vector<2x8x16xf32>
    "tpu.trace_stop"() : () -> ()
    %85 = vector.shape_cast %84 : vector<2x8x16xf32> to vector<16x16xf32>
    %86 = vector.extract_strided_slice %56 {offsets = [0, 0], sizes = [16, 32], strides = [1, 1]} : vector<32x32xf32> to vector<16x32xf32>
    %cst_41 = arith.constant dense<0.000000e+00> : vector<16x32xf32>
    %87 = tpu.matmul %85, %86, %cst_41 {dimension_numbers = #tpu.dot_dimension_numbers<[1], [0], [0], [1], [0, 0, 1, 1], [], []>} : vector<16x16xf32>, vector<16x32xf32>, vector<16x32xf32> -> vector<16x32xf32>
    %88 = arith.addf %62, %87 : vector<16x32xf32>
    %89 = vector.extract_strided_slice %61 {offsets = [0, 16], sizes = [16, 16], strides = [1, 1]} : vector<16x96xf32> to vector<16x16xf32>
    %90 = vector.shape_cast %89 : vector<16x16xf32> to vector<2x8x16xf32>
    %91 = vector.extract_strided_slice %61 {offsets = [0, 48], sizes = [16, 16], strides = [1, 1]} : vector<16x96xf32> to vector<16x16xf32>
    %92 = vector.shape_cast %91 : vector<16x16xf32> to vector<2x8x16xf32>
    %93 = vector.extract_strided_slice %61 {offsets = [0, 80], sizes = [16, 16], strides = [1, 1]} : vector<16x96xf32> to vector<16x16xf32>
    %94 = vector.shape_cast %93 : vector<16x16xf32> to vector<2x8x16xf32>
    "tpu.trace_start"() <{level = 10 : i32, message = "bqd,bkd->bqk"}> : () -> ()
    %cst_42 = arith.constant dense<0.000000e+00> : vector<2x8x8xf32>
    %95 = tpu.matmul %90, %92, %cst_42 {dimension_numbers = #tpu.dot_dimension_numbers<[2], [2], [1], [1], [0, 0, 0, 1, 1, 1], [0], [0]>} : vector<2x8x16xf32>, vector<2x8x16xf32>, vector<2x8x8xf32> -> vector<2x8x8xf32>
    "tpu.trace_stop"() : () -> ()
    %cst_43 = arith.constant 2.500000e-01 : f32
    %96 = vector.broadcast %cst_43 : f32 to vector<2x8x8xf32>
    %97 = arith.mulf %95, %96 : vector<2x8x8xf32>
    %98 = vector.broadcast %50 : vector<2x1x8xf32> to vector<2x8x8xf32>
    %99 = arith.addf %97, %98 : vector<2x8x8xf32>
    %cst_44 = arith.constant dense<0xFF800000> : vector<2x8xf32>
    %100 = vector.multi_reduction <maximumf>, %99, %cst_44 [2] : vector<2x8x8xf32> to vector<2x8xf32>
    %101 = vector.shape_cast %100 : vector<2x8xf32> to vector<2x8x1xf32>
    %102 = vector.broadcast %101 : vector<2x8x1xf32> to vector<2x8x8xf32>
    %103 = arith.subf %99, %102 : vector<2x8x8xf32>
    %104 = math.exp %103 : vector<2x8x8xf32>
    %cst_45 = arith.constant dense<0.000000e+00> : vector<2x8xf32>
    %105 = vector.multi_reduction <add>, %104, %cst_45 [2] : vector<2x8x8xf32> to vector<2x8xf32>
    %106 = vector.shape_cast %105 : vector<2x8xf32> to vector<2x8x1xf32>
    %107 = tpu.reciprocal %106 {approx = true} : vector<2x8x1xf32> -> vector<2x8x1xf32>
    %108 = vector.broadcast %107 : vector<2x8x1xf32> to vector<2x8x8xf32>
    %109 = arith.mulf %104, %108 : vector<2x8x8xf32>
    "tpu.trace_start"() <{level = 10 : i32, message = "bqk,bkd->bqd"}> : () -> ()
    %cst_46 = arith.constant dense<0.000000e+00> : vector<2x8x16xf32>
    %110 = tpu.matmul %109, %94, %cst_46 {dimension_numbers = #tpu.dot_dimension_numbers<[2], [1], [1], [2], [0, 0, 0, 1, 1, 2], [0], [0]>} : vector<2x8x8xf32>, vector<2x8x16xf32>, vector<2x8x16xf32> -> vector<2x8x16xf32>
    "tpu.trace_stop"() : () -> ()
    %111 = vector.shape_cast %110 : vector<2x8x16xf32> to vector<16x16xf32>
    %112 = vector.extract_strided_slice %56 {offsets = [16, 0], sizes = [16, 32], strides = [1, 1]} : vector<32x32xf32> to vector<16x32xf32>
    %cst_47 = arith.constant dense<0.000000e+00> : vector<16x32xf32>
    %113 = tpu.matmul %111, %112, %cst_47 {dimension_numbers = #tpu.dot_dimension_numbers<[1], [0], [0], [1], [0, 0, 1, 1], [], []>} : vector<16x16xf32>, vector<16x32xf32>, vector<16x32xf32> -> vector<16x32xf32>
    %114 = arith.addf %88, %113 : vector<16x32xf32>
    %115 = vector.broadcast %58 : vector<1x32xf32> to vector<16x32xf32>
    %116 = arith.addf %114, %115 : vector<16x32xf32>
    %117 = arith.addf %44, %116 : vector<16x32xf32>
    %c0_48 = arith.constant 0 : index
    %c0_49 = arith.constant 0 : index
    %c0_50 = arith.constant 0 : index
    %118 = vector.load %arg11[%c0_48, %c0_49, %c0_50] : memref<2x1x32xf32, #tpu.memory_space<vmem>>, vector<1x1x32xf32>
    %119 = vector.shape_cast %118 : vector<1x1x32xf32> to vector<1x32xf32>
    %c0_51 = arith.constant 0 : index
    %c0_52 = arith.constant 0 : index
    %c0_53 = arith.constant 0 : index
    %120 = vector.load %arg12[%c0_51, %c0_52, %c0_53] : memref<2x1x32xf32, #tpu.memory_space<vmem>>, vector<1x1x32xf32>
    %121 = vector.shape_cast %120 : vector<1x1x32xf32> to vector<1x32xf32>
    %cst_54 = arith.constant dense<0.000000e+00> : vector<16xf32>
    %122 = vector.multi_reduction <add>, %117, %cst_54 [1] : vector<16x32xf32> to vector<16xf32>
    %123 = vector.shape_cast %122 : vector<16xf32> to vector<16x1xf32>
    %cst_55 = arith.constant 3.200000e+01 : f32
    %124 = vector.broadcast %cst_55 : f32 to vector<16x1xf32>
    %125 = arith.divf %123, %124 : vector<16x1xf32>
    %126 = vector.broadcast %125 : vector<16x1xf32> to vector<16x32xf32>
    %127 = arith.subf %117, %126 : vector<16x32xf32>
    %128 = arith.mulf %127, %127 : vector<16x32xf32>
    %cst_56 = arith.constant dense<0.000000e+00> : vector<16xf32>
    %129 = vector.multi_reduction <add>, %128, %cst_56 [1] : vector<16x32xf32> to vector<16xf32>
    %130 = vector.shape_cast %129 : vector<16xf32> to vector<16x1xf32>
    %cst_57 = arith.constant 3.200000e+01 : f32
    %131 = vector.broadcast %cst_57 : f32 to vector<16x1xf32>
    %132 = arith.divf %130, %131 : vector<16x1xf32>
    %133 = vector.broadcast %125 : vector<16x1xf32> to vector<16x32xf32>
    %134 = arith.subf %117, %133 : vector<16x32xf32>
    %cst_58 = arith.constant 9.99999996E-13 : f32
    %135 = vector.broadcast %cst_58 : f32 to vector<16x1xf32>
    %136 = arith.addf %132, %135 : vector<16x1xf32>
    %137 = math.rsqrt %136 : vector<16x1xf32>
    %138 = vector.broadcast %137 : vector<16x1xf32> to vector<16x32xf32>
    %139 = arith.mulf %134, %138 : vector<16x32xf32>
    %140 = vector.broadcast %119 : vector<1x32xf32> to vector<16x32xf32>
    %141 = arith.mulf %139, %140 : vector<16x32xf32>
    %142 = vector.broadcast %121 : vector<1x32xf32> to vector<16x32xf32>
    %143 = arith.addf %141, %142 : vector<16x32xf32>
    %c0_59 = arith.constant 0 : index
    %c0_60 = arith.constant 0 : index
    %c0_61 = arith.constant 0 : index
    %144 = vector.load %arg13[%c0_59, %c0_60, %c0_61] : memref<2x32x64xf32, #tpu.memory_space<vmem>>, vector<1x32x64xf32>
    %145 = vector.shape_cast %144 : vector<1x32x64xf32> to vector<32x64xf32>
    %cst_62 = arith.constant dense<0.000000e+00> : vector<16x64xf32>
    %146 = tpu.matmul %143, %145, %cst_62 {dimension_numbers = #tpu.dot_dimension_numbers<[1], [0], [0], [1], [0, 0, 1, 1], [], []>} : vector<16x32xf32>, vector<32x64xf32>, vector<16x64xf32> -> vector<16x64xf32>
    %c0_63 = arith.constant 0 : index
    %c0_64 = arith.constant 0 : index
    %c0_65 = arith.constant 0 : index
    %147 = vector.load %arg14[%c0_63, %c0_64, %c0_65] : memref<2x1x64xf32, #tpu.memory_space<vmem>>, vector<1x1x64xf32>
    %148 = vector.shape_cast %147 : vector<1x1x64xf32> to vector<1x64xf32>
    %149 = vector.broadcast %148 : vector<1x64xf32> to vector<16x64xf32>
    %150 = arith.addf %146, %149 : vector<16x64xf32>
    %cst_66 = arith.constant 5.000000e-01 : f32
    %151 = vector.broadcast %cst_66 : f32 to vector<16x64xf32>
    %152 = arith.mulf %151, %150 : vector<16x64xf32>
    %cst_67 = arith.constant 4.471500e-02 : f32
    %153 = vector.broadcast %cst_67 : f32 to vector<16x64xf32>
    %154 = arith.mulf %153, %150 : vector<16x64xf32>
    %155 = arith.mulf %154, %150 : vector<16x64xf32>
    %156 = arith.mulf %155, %150 : vector<16x64xf32>
    %157 = arith.addf %150, %156 : vector<16x64xf32>
    %cst_68 = arith.constant 0.797884583 : f32
    %158 = vector.broadcast %cst_68 : f32 to vector<16x64xf32>
    %159 = arith.mulf %158, %157 : vector<16x64xf32>
    %160 = math.tanh %159 : vector<16x64xf32>
    %cst_69 = arith.constant 1.000000e+00 : f32
    %161 = vector.broadcast %cst_69 : f32 to vector<16x64xf32>
    %162 = arith.addf %161, %160 : vector<16x64xf32>
    %163 = arith.mulf %152, %162 : vector<16x64xf32>
    %c0_70 = arith.constant 0 : index
    %c0_71 = arith.constant 0 : index
    %c0_72 = arith.constant 0 : index
    %164 = vector.load %arg15[%c0_70, %c0_71, %c0_72] : memref<2x64x32xf32, #tpu.memory_space<vmem>>, vector<1x64x32xf32>
    %165 = vector.shape_cast %164 : vector<1x64x32xf32> to vector<64x32xf32>
    %cst_73 = arith.constant dense<0.000000e+00> : vector<16x32xf32>
    %166 = tpu.matmul %163, %165, %cst_73 {dimension_numbers = #tpu.dot_dimension_numbers<[1], [0], [0], [1], [0, 0, 1, 1], [], []>} : vector<16x64xf32>, vector<64x32xf32>, vector<16x32xf32> -> vector<16x32xf32>
    %c0_74 = arith.constant 0 : index
    %c0_75 = arith.constant 0 : index
    %c0_76 = arith.constant 0 : index
    %167 = vector.load %arg16[%c0_74, %c0_75, %c0_76] : memref<2x1x32xf32, #tpu.memory_space<vmem>>, vector<1x1x32xf32>
    %168 = vector.shape_cast %167 : vector<1x1x32xf32> to vector<1x32xf32>
    %169 = vector.broadcast %168 : vector<1x32xf32> to vector<16x32xf32>
    %170 = arith.addf %166, %169 : vector<16x32xf32>
    %171 = arith.addf %143, %170 : vector<16x32xf32>
    %c0_77 = arith.constant 0 : index
    %c0_78 = arith.constant 0 : index
    %c0_79 = arith.constant 0 : index
    %172 = vector.load %arg17[%c0_77, %c0_78, %c0_79] : memref<2x1x32xf32, #tpu.memory_space<vmem>>, vector<1x1x32xf32>
    %173 = vector.shape_cast %172 : vector<1x1x32xf32> to vector<1x32xf32>
    %c0_80 = arith.constant 0 : index
    %c0_81 = arith.constant 0 : index
    %c0_82 = arith.constant 0 : index
    %174 = vector.load %arg18[%c0_80, %c0_81, %c0_82] : memref<2x1x32xf32, #tpu.memory_space<vmem>>, vector<1x1x32xf32>
    %175 = vector.shape_cast %174 : vector<1x1x32xf32> to vector<1x32xf32>
    %cst_83 = arith.constant dense<0.000000e+00> : vector<16xf32>
    %176 = vector.multi_reduction <add>, %171, %cst_83 [1] : vector<16x32xf32> to vector<16xf32>
    %177 = vector.shape_cast %176 : vector<16xf32> to vector<16x1xf32>
    %cst_84 = arith.constant 3.200000e+01 : f32
    %178 = vector.broadcast %cst_84 : f32 to vector<16x1xf32>
    %179 = arith.divf %177, %178 : vector<16x1xf32>
    %180 = vector.broadcast %179 : vector<16x1xf32> to vector<16x32xf32>
    %181 = arith.subf %171, %180 : vector<16x32xf32>
    %182 = arith.mulf %181, %181 : vector<16x32xf32>
    %cst_85 = arith.constant dense<0.000000e+00> : vector<16xf32>
    %183 = vector.multi_reduction <add>, %182, %cst_85 [1] : vector<16x32xf32> to vector<16xf32>
    %184 = vector.shape_cast %183 : vector<16xf32> to vector<16x1xf32>
    %cst_86 = arith.constant 3.200000e+01 : f32
    %185 = vector.broadcast %cst_86 : f32 to vector<16x1xf32>
    %186 = arith.divf %184, %185 : vector<16x1xf32>
    %187 = vector.broadcast %179 : vector<16x1xf32> to vector<16x32xf32>
    %188 = arith.subf %171, %187 : vector<16x32xf32>
    %cst_87 = arith.constant 9.99999996E-13 : f32
    %189 = vector.broadcast %cst_87 : f32 to vector<16x1xf32>
    %190 = arith.addf %186, %189 : vector<16x1xf32>
    %191 = math.rsqrt %190 : vector<16x1xf32>
    %192 = vector.broadcast %191 : vector<16x1xf32> to vector<16x32xf32>
    %193 = arith.mulf %188, %192 : vector<16x32xf32>
    %194 = vector.broadcast %173 : vector<1x32xf32> to vector<16x32xf32>
    %195 = arith.mulf %193, %194 : vector<16x32xf32>
    %196 = vector.broadcast %175 : vector<1x32xf32> to vector<16x32xf32>
    %197 = arith.addf %195, %196 : vector<16x32xf32>
    %c1 = arith.constant 1 : index
    %c0_88 = arith.constant 0 : index
    %c0_89 = arith.constant 0 : index
    %198 = vector.load %arg7[%c1, %c0_88, %c0_89] : memref<2x32x96xf32, #tpu.memory_space<vmem>>, vector<1x32x96xf32>
    %199 = vector.shape_cast %198 : vector<1x32x96xf32> to vector<32x96xf32>
    %c1_90 = arith.constant 1 : index
    %c0_91 = arith.constant 0 : index
    %c0_92 = arith.constant 0 : index
    %200 = vector.load %arg8[%c1_90, %c0_91, %c0_92] : memref<2x1x96xf32, #tpu.memory_space<vmem>>, vector<1x1x96xf32>
    %201 = vector.shape_cast %200 : vector<1x1x96xf32> to vector<1x96xf32>
    %c1_93 = arith.constant 1 : index
    %c0_94 = arith.constant 0 : index
    %c0_95 = arith.constant 0 : index
    %202 = vector.load %arg9[%c1_93, %c0_94, %c0_95] : memref<2x32x32xf32, #tpu.memory_space<vmem>>, vector<1x32x32xf32>
    %203 = vector.shape_cast %202 : vector<1x32x32xf32> to vector<32x32xf32>
    %c1_96 = arith.constant 1 : index
    %c0_97 = arith.constant 0 : index
    %c0_98 = arith.constant 0 : index
    %204 = vector.load %arg10[%c1_96, %c0_97, %c0_98] : memref<2x1x32xf32, #tpu.memory_space<vmem>>, vector<1x1x32xf32>
    %205 = vector.shape_cast %204 : vector<1x1x32xf32> to vector<1x32xf32>
    %cst_99 = arith.constant dense<0.000000e+00> : vector<16x96xf32>
    %206 = tpu.matmul %197, %199, %cst_99 {dimension_numbers = #tpu.dot_dimension_numbers<[1], [0], [0], [1], [0, 0, 1, 1], [], []>} : vector<16x32xf32>, vector<32x96xf32>, vector<16x96xf32> -> vector<16x96xf32>
    %207 = vector.broadcast %201 : vector<1x96xf32> to vector<16x96xf32>
    %208 = arith.addf %206, %207 : vector<16x96xf32>
    %cst_100 = arith.constant 0.000000e+00 : f32
    %209 = vector.broadcast %cst_100 : f32 to vector<16x32xf32>
    %210 = vector.extract_strided_slice %208 {offsets = [0, 0], sizes = [16, 16], strides = [1, 1]} : vector<16x96xf32> to vector<16x16xf32>
    %211 = vector.shape_cast %210 : vector<16x16xf32> to vector<2x8x16xf32>
    %212 = vector.extract_strided_slice %208 {offsets = [0, 32], sizes = [16, 16], strides = [1, 1]} : vector<16x96xf32> to vector<16x16xf32>
    %213 = vector.shape_cast %212 : vector<16x16xf32> to vector<2x8x16xf32>
    %214 = vector.extract_strided_slice %208 {offsets = [0, 64], sizes = [16, 16], strides = [1, 1]} : vector<16x96xf32> to vector<16x16xf32>
    %215 = vector.shape_cast %214 : vector<16x16xf32> to vector<2x8x16xf32>
    "tpu.trace_start"() <{level = 10 : i32, message = "bqd,bkd->bqk"}> : () -> ()
    %cst_101 = arith.constant dense<0.000000e+00> : vector<2x8x8xf32>
    %216 = tpu.matmul %211, %213, %cst_101 {dimension_numbers = #tpu.dot_dimension_numbers<[2], [2], [1], [1], [0, 0, 0, 1, 1, 1], [0], [0]>} : vector<2x8x16xf32>, vector<2x8x16xf32>, vector<2x8x8xf32> -> vector<2x8x8xf32>
    "tpu.trace_stop"() : () -> ()
    %cst_102 = arith.constant 2.500000e-01 : f32
    %217 = vector.broadcast %cst_102 : f32 to vector<2x8x8xf32>
    %218 = arith.mulf %216, %217 : vector<2x8x8xf32>
    %219 = vector.broadcast %50 : vector<2x1x8xf32> to vector<2x8x8xf32>
    %220 = arith.addf %218, %219 : vector<2x8x8xf32>
    %cst_103 = arith.constant dense<0xFF800000> : vector<2x8xf32>
    %221 = vector.multi_reduction <maximumf>, %220, %cst_103 [2] : vector<2x8x8xf32> to vector<2x8xf32>
    %222 = vector.shape_cast %221 : vector<2x8xf32> to vector<2x8x1xf32>
    %223 = vector.broadcast %222 : vector<2x8x1xf32> to vector<2x8x8xf32>
    %224 = arith.subf %220, %223 : vector<2x8x8xf32>
    %225 = math.exp %224 : vector<2x8x8xf32>
    %cst_104 = arith.constant dense<0.000000e+00> : vector<2x8xf32>
    %226 = vector.multi_reduction <add>, %225, %cst_104 [2] : vector<2x8x8xf32> to vector<2x8xf32>
    %227 = vector.shape_cast %226 : vector<2x8xf32> to vector<2x8x1xf32>
    %228 = tpu.reciprocal %227 {approx = true} : vector<2x8x1xf32> -> vector<2x8x1xf32>
    %229 = vector.broadcast %228 : vector<2x8x1xf32> to vector<2x8x8xf32>
    %230 = arith.mulf %225, %229 : vector<2x8x8xf32>
    "tpu.trace_start"() <{level = 10 : i32, message = "bqk,bkd->bqd"}> : () -> ()
    %cst_105 = arith.constant dense<0.000000e+00> : vector<2x8x16xf32>
    %231 = tpu.matmul %230, %215, %cst_105 {dimension_numbers = #tpu.dot_dimension_numbers<[2], [1], [1], [2], [0, 0, 0, 1, 1, 2], [0], [0]>} : vector<2x8x8xf32>, vector<2x8x16xf32>, vector<2x8x16xf32> -> vector<2x8x16xf32>
    "tpu.trace_stop"() : () -> ()
    %232 = vector.shape_cast %231 : vector<2x8x16xf32> to vector<16x16xf32>
    %233 = vector.extract_strided_slice %203 {offsets = [0, 0], sizes = [16, 32], strides = [1, 1]} : vector<32x32xf32> to vector<16x32xf32>
    %cst_106 = arith.constant dense<0.000000e+00> : vector<16x32xf32>
    %234 = tpu.matmul %232, %233, %cst_106 {dimension_numbers = #tpu.dot_dimension_numbers<[1], [0], [0], [1], [0, 0, 1, 1], [], []>} : vector<16x16xf32>, vector<16x32xf32>, vector<16x32xf32> -> vector<16x32xf32>
    %235 = arith.addf %209, %234 : vector<16x32xf32>
    %236 = vector.extract_strided_slice %208 {offsets = [0, 16], sizes = [16, 16], strides = [1, 1]} : vector<16x96xf32> to vector<16x16xf32>
    %237 = vector.shape_cast %236 : vector<16x16xf32> to vector<2x8x16xf32>
    %238 = vector.extract_strided_slice %208 {offsets = [0, 48], sizes = [16, 16], strides = [1, 1]} : vector<16x96xf32> to vector<16x16xf32>
    %239 = vector.shape_cast %238 : vector<16x16xf32> to vector<2x8x16xf32>
    %240 = vector.extract_strided_slice %208 {offsets = [0, 80], sizes = [16, 16], strides = [1, 1]} : vector<16x96xf32> to vector<16x16xf32>
    %241 = vector.shape_cast %240 : vector<16x16xf32> to vector<2x8x16xf32>
    "tpu.trace_start"() <{level = 10 : i32, message = "bqd,bkd->bqk"}> : () -> ()
    %cst_107 = arith.constant dense<0.000000e+00> : vector<2x8x8xf32>
    %242 = tpu.matmul %237, %239, %cst_107 {dimension_numbers = #tpu.dot_dimension_numbers<[2], [2], [1], [1], [0, 0, 0, 1, 1, 1], [0], [0]>} : vector<2x8x16xf32>, vector<2x8x16xf32>, vector<2x8x8xf32> -> vector<2x8x8xf32>
    "tpu.trace_stop"() : () -> ()
    %cst_108 = arith.constant 2.500000e-01 : f32
    %243 = vector.broadcast %cst_108 : f32 to vector<2x8x8xf32>
    %244 = arith.mulf %242, %243 : vector<2x8x8xf32>
    %245 = vector.broadcast %50 : vector<2x1x8xf32> to vector<2x8x8xf32>
    %246 = arith.addf %244, %245 : vector<2x8x8xf32>
    %cst_109 = arith.constant dense<0xFF800000> : vector<2x8xf32>
    %247 = vector.multi_reduction <maximumf>, %246, %cst_109 [2] : vector<2x8x8xf32> to vector<2x8xf32>
    %248 = vector.shape_cast %247 : vector<2x8xf32> to vector<2x8x1xf32>
    %249 = vector.broadcast %248 : vector<2x8x1xf32> to vector<2x8x8xf32>
    %250 = arith.subf %246, %249 : vector<2x8x8xf32>
    %251 = math.exp %250 : vector<2x8x8xf32>
    %cst_110 = arith.constant dense<0.000000e+00> : vector<2x8xf32>
    %252 = vector.multi_reduction <add>, %251, %cst_110 [2] : vector<2x8x8xf32> to vector<2x8xf32>
    %253 = vector.shape_cast %252 : vector<2x8xf32> to vector<2x8x1xf32>
    %254 = tpu.reciprocal %253 {approx = true} : vector<2x8x1xf32> -> vector<2x8x1xf32>
    %255 = vector.broadcast %254 : vector<2x8x1xf32> to vector<2x8x8xf32>
    %256 = arith.mulf %251, %255 : vector<2x8x8xf32>
    "tpu.trace_start"() <{level = 10 : i32, message = "bqk,bkd->bqd"}> : () -> ()
    %cst_111 = arith.constant dense<0.000000e+00> : vector<2x8x16xf32>
    %257 = tpu.matmul %256, %241, %cst_111 {dimension_numbers = #tpu.dot_dimension_numbers<[2], [1], [1], [2], [0, 0, 0, 1, 1, 2], [0], [0]>} : vector<2x8x8xf32>, vector<2x8x16xf32>, vector<2x8x16xf32> -> vector<2x8x16xf32>
    "tpu.trace_stop"() : () -> ()
    %258 = vector.shape_cast %257 : vector<2x8x16xf32> to vector<16x16xf32>
    %259 = vector.extract_strided_slice %203 {offsets = [16, 0], sizes = [16, 32], strides = [1, 1]} : vector<32x32xf32> to vector<16x32xf32>
    %cst_112 = arith.constant dense<0.000000e+00> : vector<16x32xf32>
    %260 = tpu.matmul %258, %259, %cst_112 {dimension_numbers = #tpu.dot_dimension_numbers<[1], [0], [0], [1], [0, 0, 1, 1], [], []>} : vector<16x16xf32>, vector<16x32xf32>, vector<16x32xf32> -> vector<16x32xf32>
    %261 = arith.addf %235, %260 : vector<16x32xf32>
    %262 = vector.broadcast %205 : vector<1x32xf32> to vector<16x32xf32>
    %263 = arith.addf %261, %262 : vector<16x32xf32>
    %264 = arith.addf %197, %263 : vector<16x32xf32>
    %c1_113 = arith.constant 1 : index
    %c0_114 = arith.constant 0 : index
    %c0_115 = arith.constant 0 : index
    %265 = vector.load %arg11[%c1_113, %c0_114, %c0_115] : memref<2x1x32xf32, #tpu.memory_space<vmem>>, vector<1x1x32xf32>
    %266 = vector.shape_cast %265 : vector<1x1x32xf32> to vector<1x32xf32>
    %c1_116 = arith.constant 1 : index
    %c0_117 = arith.constant 0 : index
    %c0_118 = arith.constant 0 : index
    %267 = vector.load %arg12[%c1_116, %c0_117, %c0_118] : memref<2x1x32xf32, #tpu.memory_space<vmem>>, vector<1x1x32xf32>
    %268 = vector.shape_cast %267 : vector<1x1x32xf32> to vector<1x32xf32>
    %cst_119 = arith.constant dense<0.000000e+00> : vector<16xf32>
    %269 = vector.multi_reduction <add>, %264, %cst_119 [1] : vector<16x32xf32> to vector<16xf32>
    %270 = vector.shape_cast %269 : vector<16xf32> to vector<16x1xf32>
    %cst_120 = arith.constant 3.200000e+01 : f32
    %271 = vector.broadcast %cst_120 : f32 to vector<16x1xf32>
    %272 = arith.divf %270, %271 : vector<16x1xf32>
    %273 = vector.broadcast %272 : vector<16x1xf32> to vector<16x32xf32>
    %274 = arith.subf %264, %273 : vector<16x32xf32>
    %275 = arith.mulf %274, %274 : vector<16x32xf32>
    %cst_121 = arith.constant dense<0.000000e+00> : vector<16xf32>
    %276 = vector.multi_reduction <add>, %275, %cst_121 [1] : vector<16x32xf32> to vector<16xf32>
    %277 = vector.shape_cast %276 : vector<16xf32> to vector<16x1xf32>
    %cst_122 = arith.constant 3.200000e+01 : f32
    %278 = vector.broadcast %cst_122 : f32 to vector<16x1xf32>
    %279 = arith.divf %277, %278 : vector<16x1xf32>
    %280 = vector.broadcast %272 : vector<16x1xf32> to vector<16x32xf32>
    %281 = arith.subf %264, %280 : vector<16x32xf32>
    %cst_123 = arith.constant 9.99999996E-13 : f32
    %282 = vector.broadcast %cst_123 : f32 to vector<16x1xf32>
    %283 = arith.addf %279, %282 : vector<16x1xf32>
    %284 = math.rsqrt %283 : vector<16x1xf32>
    %285 = vector.broadcast %284 : vector<16x1xf32> to vector<16x32xf32>
    %286 = arith.mulf %281, %285 : vector<16x32xf32>
    %287 = vector.broadcast %266 : vector<1x32xf32> to vector<16x32xf32>
    %288 = arith.mulf %286, %287 : vector<16x32xf32>
    %289 = vector.broadcast %268 : vector<1x32xf32> to vector<16x32xf32>
    %290 = arith.addf %288, %289 : vector<16x32xf32>
    %c1_124 = arith.constant 1 : index
    %c0_125 = arith.constant 0 : index
    %c0_126 = arith.constant 0 : index
    %291 = vector.load %arg13[%c1_124, %c0_125, %c0_126] : memref<2x32x64xf32, #tpu.memory_space<vmem>>, vector<1x32x64xf32>
    %292 = vector.shape_cast %291 : vector<1x32x64xf32> to vector<32x64xf32>
    %cst_127 = arith.constant dense<0.000000e+00> : vector<16x64xf32>
    %293 = tpu.matmul %290, %292, %cst_127 {dimension_numbers = #tpu.dot_dimension_numbers<[1], [0], [0], [1], [0, 0, 1, 1], [], []>} : vector<16x32xf32>, vector<32x64xf32>, vector<16x64xf32> -> vector<16x64xf32>
    %c1_128 = arith.constant 1 : index
    %c0_129 = arith.constant 0 : index
    %c0_130 = arith.constant 0 : index
    %294 = vector.load %arg14[%c1_128, %c0_129, %c0_130] : memref<2x1x64xf32, #tpu.memory_space<vmem>>, vector<1x1x64xf32>
    %295 = vector.shape_cast %294 : vector<1x1x64xf32> to vector<1x64xf32>
    %296 = vector.broadcast %295 : vector<1x64xf32> to vector<16x64xf32>
    %297 = arith.addf %293, %296 : vector<16x64xf32>
    %cst_131 = arith.constant 5.000000e-01 : f32
    %298 = vector.broadcast %cst_131 : f32 to vector<16x64xf32>
    %299 = arith.mulf %298, %297 : vector<16x64xf32>
    %cst_132 = arith.constant 4.471500e-02 : f32
    %300 = vector.broadcast %cst_132 : f32 to vector<16x64xf32>
    %301 = arith.mulf %300, %297 : vector<16x64xf32>
    %302 = arith.mulf %301, %297 : vector<16x64xf32>
    %303 = arith.mulf %302, %297 : vector<16x64xf32>
    %304 = arith.addf %297, %303 : vector<16x64xf32>
    %cst_133 = arith.constant 0.797884583 : f32
    %305 = vector.broadcast %cst_133 : f32 to vector<16x64xf32>
    %306 = arith.mulf %305, %304 : vector<16x64xf32>
    %307 = math.tanh %306 : vector<16x64xf32>
    %cst_134 = arith.constant 1.000000e+00 : f32
    %308 = vector.broadcast %cst_134 : f32 to vector<16x64xf32>
    %309 = arith.addf %308, %307 : vector<16x64xf32>
    %310 = arith.mulf %299, %309 : vector<16x64xf32>
    %c1_135 = arith.constant 1 : index
    %c0_136 = arith.constant 0 : index
    %c0_137 = arith.constant 0 : index
    %311 = vector.load %arg15[%c1_135, %c0_136, %c0_137] : memref<2x64x32xf32, #tpu.memory_space<vmem>>, vector<1x64x32xf32>
    %312 = vector.shape_cast %311 : vector<1x64x32xf32> to vector<64x32xf32>
    %cst_138 = arith.constant dense<0.000000e+00> : vector<16x32xf32>
    %313 = tpu.matmul %310, %312, %cst_138 {dimension_numbers = #tpu.dot_dimension_numbers<[1], [0], [0], [1], [0, 0, 1, 1], [], []>} : vector<16x64xf32>, vector<64x32xf32>, vector<16x32xf32> -> vector<16x32xf32>
    %c1_139 = arith.constant 1 : index
    %c0_140 = arith.constant 0 : index
    %c0_141 = arith.constant 0 : index
    %314 = vector.load %arg16[%c1_139, %c0_140, %c0_141] : memref<2x1x32xf32, #tpu.memory_space<vmem>>, vector<1x1x32xf32>
    %315 = vector.shape_cast %314 : vector<1x1x32xf32> to vector<1x32xf32>
    %316 = vector.broadcast %315 : vector<1x32xf32> to vector<16x32xf32>
    %317 = arith.addf %313, %316 : vector<16x32xf32>
    %318 = arith.addf %290, %317 : vector<16x32xf32>
    %c1_142 = arith.constant 1 : index
    %c0_143 = arith.constant 0 : index
    %c0_144 = arith.constant 0 : index
    %319 = vector.load %arg17[%c1_142, %c0_143, %c0_144] : memref<2x1x32xf32, #tpu.memory_space<vmem>>, vector<1x1x32xf32>
    %320 = vector.shape_cast %319 : vector<1x1x32xf32> to vector<1x32xf32>
    %c1_145 = arith.constant 1 : index
    %c0_146 = arith.constant 0 : index
    %c0_147 = arith.constant 0 : index
    %321 = vector.load %arg18[%c1_145, %c0_146, %c0_147] : memref<2x1x32xf32, #tpu.memory_space<vmem>>, vector<1x1x32xf32>
    %322 = vector.shape_cast %321 : vector<1x1x32xf32> to vector<1x32xf32>
    %cst_148 = arith.constant dense<0.000000e+00> : vector<16xf32>
    %323 = vector.multi_reduction <add>, %318, %cst_148 [1] : vector<16x32xf32> to vector<16xf32>
    %324 = vector.shape_cast %323 : vector<16xf32> to vector<16x1xf32>
    %cst_149 = arith.constant 3.200000e+01 : f32
    %325 = vector.broadcast %cst_149 : f32 to vector<16x1xf32>
    %326 = arith.divf %324, %325 : vector<16x1xf32>
    %327 = vector.broadcast %326 : vector<16x1xf32> to vector<16x32xf32>
    %328 = arith.subf %318, %327 : vector<16x32xf32>
    %329 = arith.mulf %328, %328 : vector<16x32xf32>
    %cst_150 = arith.constant dense<0.000000e+00> : vector<16xf32>
    %330 = vector.multi_reduction <add>, %329, %cst_150 [1] : vector<16x32xf32> to vector<16xf32>
    %331 = vector.shape_cast %330 : vector<16xf32> to vector<16x1xf32>
    %cst_151 = arith.constant 3.200000e+01 : f32
    %332 = vector.broadcast %cst_151 : f32 to vector<16x1xf32>
    %333 = arith.divf %331, %332 : vector<16x1xf32>
    %334 = vector.broadcast %326 : vector<16x1xf32> to vector<16x32xf32>
    %335 = arith.subf %318, %334 : vector<16x32xf32>
    %cst_152 = arith.constant 9.99999996E-13 : f32
    %336 = vector.broadcast %cst_152 : f32 to vector<16x1xf32>
    %337 = arith.addf %333, %336 : vector<16x1xf32>
    %338 = math.rsqrt %337 : vector<16x1xf32>
    %339 = vector.broadcast %338 : vector<16x1xf32> to vector<16x32xf32>
    %340 = arith.mulf %335, %339 : vector<16x32xf32>
    %341 = vector.broadcast %320 : vector<1x32xf32> to vector<16x32xf32>
    %342 = arith.mulf %340, %341 : vector<16x32xf32>
    %343 = vector.broadcast %322 : vector<1x32xf32> to vector<16x32xf32>
    %344 = arith.addf %342, %343 : vector<16x32xf32>
    %345 = tpu.iota {dimensions = array<i32: 0>} : vector<2x16xi32>
    %346 = tpu.iota {dimensions = array<i32: 1>} : vector<2x16xi32>
    %c8_i32 = arith.constant 8 : i32
    %347 = vector.broadcast %c8_i32 : i32 to vector<2x16xi32>
    %348 = arith.muli %345, %347 : vector<2x16xi32>
    %349 = arith.cmpi eq, %346, %348 : vector<2x16xi32>
    %350 = arith.extui %349 : vector<2x16xi1> to vector<2x16xi32>
    %351 = arith.sitofp %350 : vector<2x16xi32> to vector<2x16xf32>
    %cst_153 = arith.constant dense<0.000000e+00> : vector<2x32xf32>
    %352 = tpu.matmul %351, %344, %cst_153 {dimension_numbers = #tpu.dot_dimension_numbers<[1], [0], [0], [1], [0, 0, 1, 1], [], []>} : vector<2x16xf32>, vector<16x32xf32>, vector<2x32xf32> -> vector<2x32xf32>
    %c0_154 = arith.constant 0 : index
    %c0_155 = arith.constant 0 : index
    %353 = vector.load %arg19[%c0_154, %c0_155] : memref<32x32xf32, #tpu.memory_space<vmem>>, vector<32x32xf32>
    %cst_156 = arith.constant dense<0.000000e+00> : vector<2x32xf32>
    %354 = tpu.matmul %352, %353, %cst_156 {dimension_numbers = #tpu.dot_dimension_numbers<[1], [0], [0], [1], [0, 0, 1, 1], [], []>} : vector<2x32xf32>, vector<32x32xf32>, vector<2x32xf32> -> vector<2x32xf32>
    %c0_157 = arith.constant 0 : index
    %c0_158 = arith.constant 0 : index
    %355 = vector.load %arg20[%c0_157, %c0_158] : memref<1x32xf32, #tpu.memory_space<vmem>>, vector<1x32xf32>
    %356 = vector.broadcast %355 : vector<1x32xf32> to vector<2x32xf32>
    %357 = arith.addf %354, %356 : vector<2x32xf32>
    %358 = math.tanh %357 : vector<2x32xf32>
    %c0_159 = arith.constant 0 : index
    %c0_160 = arith.constant 0 : index
    %359 = vector.load %arg21[%c0_159, %c0_160] : memref<2x32xf32, #tpu.memory_space<vmem>>, vector<2x32xf32>
    tpu.vector_store %arg21[%c0_159, %c0_160], %358 {strides = array<i32>} : memref<2x32xf32, #tpu.memory_space<vmem>>, vector<2x32xf32>,
    return
  }
}

</mosaic_0001>

<bundles_post_ra>
// kernel: tpu_custom_call.1
= control target key start
LH: loop header
LB: loop body
LE: loop exit
PB: predicated region body
PF: predicated region fallthrough
CT: control target
= control target key end

     0   :  { %s4586_s0 = inlined_call_operand.vmem [shape: s32[16,1], index: 0, kind: input, shape index: {}]   ;;  %s4587_s1 = inlined_call_operand.vmem [shape: s32[2,1,8], index: 1, kind: input, shape index: {}]   ;;  %s4588_s2 = inlined_call_operand.hbm [shape: f32[30,32], index: 2, kind: input, shape index: {}]   ;;  %s4589_s3 = inlined_call_operand.hbm [shape: f32[16,32], index: 3, kind: input, shape index: {}]   ;;  %s4590_s4 = inlined_call_operand.vmem [shape: f32[2,32], index: 4, kind: input, shape index: {}]   ;;  %s4591_s5 = inlined_call_operand.vmem [shape: f32[1,32], index: 5, kind: input, shape index: {}]   ;;  %s4592_s6 = inlined_call_operand.hbm [shape: f32[1,32], index: 6, kind: input, shape index: {}]   ;;  %s4593_s7 = inlined_call_operand.vmem [shape: f32[2,32,96], index: 7, kind: input, shape index: {}]   ;;  %s4594_s8 = inlined_call_operand.vmem [shape: f32[2,1,96], index: 8, kind: input, shape index: {}]   ;;  %s4595_s9 = inlined_call_operand.vmem [shape: f32[2,32,32], index: 9, kind: input, shape index: {}]   ;;  %s4596_s10 = inlined_call_operand.vmem [shape: f32[2,1,32], index: 10, kind: input, shape index: {}]   ;;  %s4597_s11 = inlined_call_operand.hbm [shape: f32[2,1,32], index: 11, kind: input, shape index: {}]   ;;  %s4598_s12 = inlined_call_operand.hbm [shape: f32[2,1,32], index: 12, kind: input, shape index: {}]   ;;  %s4599_s13 = inlined_call_operand.vmem [shape: f32[2,32,64], index: 13, kind: input, shape index: {}]   ;;  %s4600_s14 = inlined_call_operand.hbm [shape: f32[2,1,64], index: 14, kind: input, shape index: {}]   ;;  %s4601_s15 = inlined_call_operand.vmem [shape: f32[2,64,32], index: 15, kind: input, shape index: {}]   ;;  %s4602_s16 = inlined_call_operand.vmem [shape: f32[2,1,32], index: 16, kind: input, shape index: {}]   ;;  %s4603_s17 = inlined_call_operand.vmem [shape: f32[2,1,32], index: 17, kind: input, shape index: {}]   ;;  %s4604_s18 = inlined_call_operand.vmem [shape: f32[2,1,32], index: 18, kind: input, shape index: {}]   ;;  %s4605_s19 = inlined_call_operand.hbm [shape: f32[32,32], index: 19, kind: input, shape index: {}]   ;;  %s4606_s20 = inlined_call_operand.vmem [shape: f32[1,32], index: 20, kind: input, shape index: {}]   ;;  %s4607_s21 = inlined_call_operand.hbm [shape: f32[2,32], index: 21, kind: output, shape index: {}]  }
   0x1   :  { %4618 = sst [smem:[#allocation20_spill]] %s4586_s0 }
   0x2   :  { %4619 = sst [smem:[#allocation21_spill]] %s4587_s1 }
   0x3   :  { %4620 = sst [smem:[#allocation22_spill]] %s4588_s2 }
   0x4   :  { %4621 = sst [smem:[#allocation23_spill]] %s4589_s3 }
   0x5   :  { %4622 = sst [smem:[#allocation24_spill]] %s4590_s4 }
   0x6   :  { %4623 = sst [smem:[#allocation25_spill]] %s4591_s5 }
   0x7   :  { %4624 = sst [smem:[#allocation26_spill]] %s4607_s21 }
   0x8   :  { %26 = vsyncpa [#allocation3], 0 }
   0x9   :  { %27 = vsyncpa [#allocation6], 0 }
   0xa   :  { %28 = vsyncpa [#allocation9], 0 }
   0xb   :  { %29 = vsyncpa [#allocation12], 0 }
   0xc   :  { %30 = vsyncpa [#allocation4], 0  ;;  %s3911_s2 = smov [#allocation5]   ;;  %s3912_s26 = smov [#allocation8]  }
   0xd   :  { %s52_s25 = sshll.u32 %s3911_s2, 4  ;;  %s86_s27 = sshll.u32 %s3912_s26, 4  ;;  %s53_s25 = int_to_ptr.vmem [resolvable:$true] %s52_s25  ;;  %s4043_s27 = int_to_ptr.vmem [resolvable:$true] %s86_s27 }
   0xe   :  { %s4625_s29 = sld [smem:[#allocation23_spill]] }
  0x14   :  { %s3725_s0 = scalar_lea.hbm %s4625_s29, 256 }
  0x15   :  { %p3726_p0 = scmp.ne.s32.totalorder %s4625_s29, %s3725_s0  ;;  %p3729_p1 = scmp.lt.u32.totalorder %s3725_s0, %s4625_s29 }
  0x17   :  { %p3731_p2 = pnand %p3729_p1, %p3726_p0 }
  0x19   :  { %3734 = shalt.err (!%p3731_p2)
}
  0x1a   :  { %s3735_s23 = scalar_lea.vmem %s53_s25, 256  ;;  %p3740_p4 = scmp.lt.s32.totalorder %s53_s25, %s53_s25 }
  0x1b   :  { %p3736_p3 = scmp.ne.s32.totalorder %s53_s25, %s3735_s23  ;;  %p3741_p5 = scmp.lt.s32.totalorder %s3735_s23, %s3735_s23 }
  0x1d   :  { %p3742_p6 = por %p3741_p5, %p3740_p4 }
  0x1f   :  { %p3743_p7 = pnand %p3742_p6, %p3736_p3 }
  0x21   :  { %3746 = shalt.err (!%p3743_p7)
}
  0x22   :  { %s4612_s1 = smov 128   ;;  %s4614_s24 = smov 8  }
  0x23   :  { %58 = dma.hbm_to_vmem [thread:$0]  %s4625_s29, 256, %s53_s25, [#allocation6], %s4612_s1, %s4612_s1, %s4614_s24  }
  0x24   :  { %s3747_s0 = scalar_lea.hbm %s4597_s11, 32 }
  0x25   :  { %p3748_p8 = scmp.ne.s32.totalorder %s4597_s11, %s3747_s0  ;;  %p3751_p9 = scmp.lt.u32.totalorder %s3747_s0, %s4597_s11 }
  0x27   :  { %p3753_p10 = pnand %p3751_p9, %p3748_p8 }
  0x29   :  { %3756 = shalt.err (!%p3753_p10)
}
  0x2a   :  { %s3757_s23 = scalar_lea.vmem %s4043_s27, 32  ;;  %p3762_p12 = scmp.lt.s32.totalorder %s4043_s27, %s4043_s27 }
  0x2b   :  { %p3758_p11 = scmp.ne.s32.totalorder %s4043_s27, %s3757_s23  ;;  %p3763_p13 = scmp.lt.s32.totalorder %s3757_s23, %s3757_s23 }
  0x2d   :  { %p3764_p0 = por %p3763_p13, %p3762_p12 }
  0x2f   :  { %p3765_p1 = pnand %p3764_p0, %p3758_p11 }
  0x31   :  { %3768 = shalt.err (!%p3765_p1)
}
  0x32   :  { %s4617_s25 = smov 16   ;;  %s3916_s29 = smov 1  }
  0x33   :  { %92 = dma.hbm_to_vmem [thread:$0]  %s4597_s11, 32, %s4043_s27, [#allocation9], %s4617_s25, %s4617_s25, %s3916_s29  }
  0x34   :  { %s3917_s3 = smov [#allocation11]   ;;  %s3918_s0 = smov [#allocation2]  }
  0x35   :  { %s112_s28 = sshll.u32 %s3917_s3, 4  ;;  %s40_s4 = sshll.u32 %s3918_s0, 4  ;;  %s113_s28 = int_to_ptr.vmem [resolvable:$true] %s112_s28  ;;  %s4080_s4 = int_to_ptr.vmem [resolvable:$true] %s40_s4 }
  0x36   :  { %s3769_s22 = scalar_lea.hbm %s4600_s14, 32 }
  0x37   :  { %p3770_p2 = scmp.ne.s32.totalorder %s4600_s14, %s3769_s22  ;;  %p3773_p3 = scmp.lt.u32.totalorder %s3769_s22, %s4600_s14 }
  0x39   :  { %p3775_p4 = pnand %p3773_p3, %p3770_p2 }
  0x3b   :  { %3778 = shalt.err (!%p3775_p4)
}
  0x3c   :  { %s3779_s11 = scalar_lea.vmem %s113_s28, 32  ;;  %p3784_p6 = scmp.lt.s32.totalorder %s113_s28, %s113_s28 }
  0x3d   :  { %p3780_p5 = scmp.ne.s32.totalorder %s113_s28, %s3779_s11  ;;  %p3785_p7 = scmp.lt.s32.totalorder %s3779_s11, %s3779_s11 }
  0x3f   :  { %p3786_p8 = por %p3785_p7, %p3784_p6 }
  0x41   :  { %p3787_p9 = pnand %p3786_p8, %p3780_p5 }
  0x43   :  { %3790 = shalt.err (!%p3787_p9)
}
  0x44   :  { %118 = dma.hbm_to_vmem [thread:$0]  %s4600_s14, 32, %s113_s28, [#allocation12], %s4617_s25, %s4617_s25, %s3916_s29  }
  0x45   :  { %s4626_s21 = sld [smem:[#allocation22_spill]] }
  0x4b   :  { %s3791_s24 = scalar_lea.hbm %s4626_s21, 512 }
  0x4c   :  { %p3792_p10 = scmp.ne.s32.totalorder %s4626_s21, %s3791_s24  ;;  %p3795_p11 = scmp.lt.u32.totalorder %s3791_s24, %s4626_s21 }
  0x4e   :  { %p3797_p12 = pnand %p3795_p11, %p3792_p10 }
  0x50   :  { %3800 = shalt.err (!%p3797_p12)
}
  0x51   :  { %s3801_s22 = scalar_lea.vmem %s4080_s4, 512  ;;  %p3806_p0 = scmp.lt.s32.totalorder %s4080_s4, %s4080_s4 }
  0x52   :  { %p3802_p13 = scmp.ne.s32.totalorder %s4080_s4, %s3801_s22  ;;  %p3807_p1 = scmp.lt.s32.totalorder %s3801_s22, %s3801_s22 }
  0x54   :  { %p3808_p2 = por %p3807_p1, %p3806_p0 }
  0x56   :  { %p3809_p3 = pnand %p3808_p2, %p3802_p13 }
  0x58   :  { %3812 = shalt.err (!%p3809_p3)
}
  0x59   :  { %s4627_s14 = smov 8   ;;  %s4628_s28 = smov 128  }
  0x5a   :  { %46 = dma.hbm_to_vmem [thread:$0]  %s4626_s21, 512, %s4080_s4, [#allocation3], %s4628_s28, %s4628_s28, %s4627_s14  }
  0x5b   :  { %s3919_s27 = smov [#allocation7]   ;;  %s3920_s1 = smov [#allocation10]  }
  0x5c   :  { %s69_s2 = sshll.u32 %s3919_s27, 4  ;;  %s98_s26 = sshll.u32 %s3920_s1, 4  ;;  %s70_s2 = int_to_ptr.vmem [resolvable:$true] %s69_s2  ;;  %s4117_s26 = int_to_ptr.vmem [resolvable:$true] %s98_s26 }
  0x5d   :  { %s3813_s0 = scalar_lea.hbm %s4592_s6, 16 }
  0x5e   :  { %p3814_p4 = scmp.ne.s32.totalorder %s4592_s6, %s3813_s0  ;;  %p3817_p5 = scmp.lt.u32.totalorder %s3813_s0, %s4592_s6 }
  0x60   :  { %p3819_p6 = pnand %p3817_p5, %p3814_p4 }
  0x62   :  { %3822 = shalt.err (!%p3819_p6)
}
  0x63   :  { %s3823_s4 = scalar_lea.vmem %s70_s2, 16  ;;  %s3827_s21 = scalar_lea.vmem %s70_s2, 32 }
  0x64   :  { %p3824_p7 = scmp.ne.s32.totalorder %s70_s2, %s3823_s4  ;;  %p3828_p8 = scmp.lt.s32.totalorder %s70_s2, %s70_s2 }
  0x65   :  { %p3829_p9 = scmp.lt.s32.totalorder %s3827_s21, %s3823_s4 }
  0x67   :  { %p3830_p10 = por %p3829_p9, %p3828_p8 }
  0x69   :  { %p3831_p11 = pnand %p3830_p10, %p3824_p7 }
  0x6b   :  { %3834 = shalt.err (!%p3831_p11)
}
  0x6c   :  { %72 = dma.hbm_to_vmem [thread:$0]  %s4592_s6, 16, %s70_s2, [#allocation6]  }
  0x6d   :  { %s3835_s24 = scalar_lea.hbm %s4598_s12, 32 }
  0x6e   :  { %p3836_p12 = scmp.ne.s32.totalorder %s4598_s12, %s3835_s24  ;;  %p3839_p13 = scmp.lt.u32.totalorder %s3835_s24, %s4598_s12 }
  0x70   :  { %p3841_p0 = pnand %p3839_p13, %p3836_p12 }
  0x72   :  { %3844 = shalt.err (!%p3841_p0)
}
  0x73   :  { %s3845_s5 = scalar_lea.vmem %s4117_s26, 32  ;;  %p3850_p2 = scmp.lt.s32.totalorder %s4117_s26, %s4117_s26 }
  0x74   :  { %p3846_p1 = scmp.ne.s32.totalorder %s4117_s26, %s3845_s5  ;;  %p3851_p3 = scmp.lt.s32.totalorder %s3845_s5, %s3845_s5 }
  0x76   :  { %p3852_p4 = por %p3851_p3, %p3850_p2 }
  0x78   :  { %p3853_p5 = pnand %p3852_p4, %p3846_p1 }
  0x7a   :  { %3856 = shalt.err (!%p3853_p5)
}
  0x7b   :  { %s4629_s6 = smov 16   ;;  %s3921_s4 = smov [#allocation13]  }
  0x7c   :  { %104 = dma.hbm_to_vmem [thread:$0]  %s4598_s12, 32, %s4117_s26, [#allocation9], %s4629_s6, %s4629_s6, %s3916_s29  }
  0x7d   :  { %s132_s21 = sshll.u32 %s3921_s4, 4  ;;  %s3857_s27 = scalar_lea.hbm %s4605_s19, 512  ;;  %s133_s21 = int_to_ptr.vmem [resolvable:$true] %s132_s21 }
  0x7e   :  { %p3858_p6 = scmp.ne.s32.totalorder %s4605_s19, %s3857_s27  ;;  %p3861_p7 = scmp.lt.u32.totalorder %s3857_s27, %s4605_s19 }
  0x80   :  { %p3863_p8 = pnand %p3861_p7, %p3858_p6 }
  0x82   :  { %3866 = shalt.err (!%p3863_p8)
}
  0x83   :  { %s3867_s0 = scalar_lea.vmem %s133_s21, 512  ;;  %p3872_p10 = scmp.lt.s32.totalorder %s133_s21, %s133_s21 }
  0x84   :  { %p3868_p9 = scmp.ne.s32.totalorder %s133_s21, %s3867_s0  ;;  %p3873_p11 = scmp.lt.s32.totalorder %s3867_s0, %s3867_s0 }
  0x86   :  { %p3874_p12 = por %p3873_p11, %p3872_p10 }
  0x88   :  { %p3875_p13 = pnand %p3874_p12, %p3868_p9 }
  0x8a   :  { %3878 = shalt.err (!%p3875_p13)
}
  0x8b   :  { %138 = dma.hbm_to_vmem [thread:$0]  %s4605_s19, 512, %s133_s21, [#allocation12], %s4628_s28, %s4628_s28, %s4627_s14  }
  0x8c   :  { %3901 = dma.done.wait [#allocation3], 512  }
  0x8d   :  { %3902 = vsyncadd [#allocation3], 4294966784 }
  0x8e   :  { %3903 = dma.done.wait [#allocation6], 272  }
  0x8f   :  { %3904 = vsyncadd [#allocation6], 4294967024 }
  0x90   :  { %3905 = dma.done.wait [#allocation9], 64  }
  0x91   :  { %3906 = vsyncadd [#allocation9], 4294967232 }
  0x92   :  { %3907 = dma.done.wait [#allocation12], 544  }
  0x93   :  { %3908 = vsyncadd [#allocation12], 4294966752  ;;  %v164_v0 = vlaneseq  ;;  %v3922_v1 = vmov 0   ;;  %vm195_vm0 = vcmask 130048   ;;  %s4630_s28 = sld [smem:[#allocation20_spill]]  ;;  %v193_v8 = vld [vmem:[#allocation5] sm:$0xff] }
  0x94   :  { %3662 = vset.pattern.permute.xlu0 %v3922_v1  ;;  %v3923_v9 = vmov 0.0   ;;  %v194_v11 = vld [vmem:[#allocation5 + $0x8] sm:$0xff]  ;;  %v178_v12 = vld [vmem:[#allocation2] sm:$0xff]  ;;  %v180_v17 = vld [vmem:[#allocation2 + $0x10] sm:$0xff]  ;;  %vm284_vm3 = vcmask 1045504   ;;  %vm3924_vm4 = vmmov 1  }
  0x95   :  { %v4166_v2 = vand.u32 127, %v164_v0  ;;  %v4168_v3 = vshrl.u32 %v164_v0, 7  ;;  %v179_v13 = vld [vmem:[#allocation2 + $0x8] sm:$0xff]  ;;  %v3531_v15 = vpack.c.bf16 %v194_v11, %v193_v8  ;;  %v181_v18 = vld [vmem:[#allocation2 + $0x18] sm:$0x3f]  ;;  %vm3540_vm5 = vmpackc.low %vm284_vm3, %vm3924_vm4  ;;  %vm277_vm6 = vcmask 244736  }
  0x96   :  { %v3535_v16 = vpack.c.bf16 %v179_v13, %v178_v12  ;;  %v3539_v20 = vpack.c.bf16 %v181_v18, %v180_v17  ;;  %s4631_s2 = sld [smem:[#allocation24_spill]]  ;;  %vm372_vm9 = vcmask 261120   ;;  %v424_v42 = vld [vmem:[%s4593_s7] sm:$0xff]  ;;  %v425_v43 = vld [vmem:[%s4593_s7 + $0x8] sm:$0xff]  ;;  %v426_v44 = vld [vmem:[%s4593_s7 + $0x10] sm:$0xff]  ;;  %s4632_s0 = sld [smem:[#allocation25_spill]] }
  0x97   :  { %v185_v4 = vand.u32 7, %v4168_v3  ;;  %v184_v5 = vadd.s32 8, %v4168_v3  ;;  %3532 = vmatprep.subr.bf16.mxu0 %v3531_v15  ;;  %v3545_v45 = vpack.c.bf16 %v425_v43, %v424_v42  ;;  %v427_v46 = vld [vmem:[%s4593_s7 + $0x18] sm:$0xff]  ;;  %v3105_v57 = vld [vmem:[#allocation7] ss:$0 sm:$0xff]  ;;  %vm3925_vm10 = vmmov 0  }
  0x98   :  { %3534 = vmatpush3.bf16.msra.mxu0 %v3531_v15  ;;  %v3549_v47 = vpack.c.bf16 %v427_v46, %v426_v44  ;;  %v3106_v0 = vld [vmem:[%s4594_s8] ss:$0 sm:$0xff]  ;;  %s3926_s19 = smov 96   ;;  %s4633_s26 = sld [smem:[#allocation21_spill]]  ;;  %vm691_vm11 = vcmask 64512   ;;  %vm1541_vm12 = vcmask 523264  }
  0x99   :  { %vm187_vm1 = vcmp.eq.s32.totalorder %v4166_v2, %v185_v4  ;;  %v186_v6 = vand.u32 7, %v184_v5  ;;  %v162_v7 = vld [vmem:[%s4630_s28] sm:$0xff]  ;;  %v163_v14 = vld [vmem:[%s4630_s28 + $0x8] sm:$0xff]  ;;  %3536 = vmatprep.subr.bf16.mxu0 %v3535_v16  ;;  %3546 = vmatprep.subr.bf16.mxu1 %v3545_v45  ;;  %s3927_s6 = smov 64   ;;  %s3929_s22 = smov 112   ;;  %vm3074_vm14 = vcmask 254976  }
  0x9a   :  { %v3096_v10 = vsel %vm187_vm1, 1.0, %v3923_v9  ;;  %167 = vperm.xlu0 %3662, %v162_v7   ;;  %3548 = vmatpush3.bf16.msra.mxu1 %v3545_v45  ;;  %s3930_s4 = smov 48   ;;  %s3932_s24 = smov [#allocation14]  }
  0x9b   :  { %3309 = vmatprep.mubr.msk.f32.mxu0 %vm195_vm0, %v3096_v10  ;;  %vm188_vm2 = vcmp.eq.s32.totalorder %v4166_v2, %v186_v6  ;;  %3550 = vmatprep.subr.bf16.mxu1 %v3549_v47  ;;  %s3082_s25 = sshll.u32 %s3932_s24, 4  ;;  %s3083_s25 = int_to_ptr.vmem [resolvable:$true] %s3082_s25 }
  0x9c   :  { %v3097_v19 = vsel %vm188_vm2, 1.0, %v3923_v9  ;;  %v3103_v25 = vld [vmem:[%s4631_s2] ss:$0 sm:$0xff]  ;;  %s3928_s2 = smov 80   ;;  %s3879_s3 = scalar_lea.vmem %s3083_s25, 32 }
  0x9d   :  { %3310 = vmatmul.mubr.msk.f32.vlgmr.msra.gmra.mrb[0].mxu0 %vm195_vm0, %v3097_v19  ;;  %v3104_v55 = vld [vmem:[%s4632_s0] ss:$0 sm:$0xff]  ;;  %p3880_p0 = scmp.ne.s32.totalorder %s3083_s25, %s3879_s3  ;;  %p3884_p1 = scmp.lt.s32.totalorder %s3083_s25, %s3083_s25 }
  0x9e   :  { %170 = vperm.xlu0 %3662, %v163_v14   ;;  %3538 = vmatpush3.bf16.msra.mxu0 %v3535_v16  ;;  %v416_v10 = vld [vmem:[%s4633_s26] sm:$0x1]  ;;  %v417_v12 = vld [vmem:[%s4633_s26 + $0x1] sm:$0x1]  ;;  %v681_v16 = vsub.s32 0, %v4168_v3  ;;  %p3885_p2 = scmp.lt.s32.totalorder %s3879_s3, %s3879_s3 }
  0x9f   :  { %3541 = vmatprep.subr.msk.bf16.mxu0 %vm3540_vm5, %v3539_v20  ;;  %3552 = vmatpush3.bf16.msra.mxu1 %v3549_v47  ;;  %v418_v11 = vcvt.s32.f32 %v416_v10  ;;  %v419_v14 = vcvt.s32.f32 %v417_v12 }
  0xa0   :  { %3334 = vmatprep.subr.mxu1 %v3923_v9  ;;  %p3886_p3 = por %p3885_p2, %p3884_p1 }
  0xa1   :  { %v420_v13 = vsub.f32 1.0, %v418_v11  ;;  %v421_v17 = vsub.f32 1.0, %v419_v14 }
  0xa2   :  { %3544 = vmatpush3.bf16.msk.msra.mxu0 %vm3540_vm5, %v3539_v20  ;;  %p3887_p4 = pnand %p3886_p3, %p3880_p0 }
  0xa3   :  { %3339 = vmatprep.subr.mxu0 %v3923_v9  ;;  %v422_v15 = vmul.f32 -10000.0, %v420_v13  ;;  %v423_v19 = vmul.f32 -10000.0, %v421_v17 }
  0xa5   :  { %v4254_v18 = vrot.slane %v422_v15, %v681_v16 }
 0x119   :  { %v168_v21 = vpop.permute.xlu0 %167 }
 0x11a   :  { %vm172_vm7 = vcmp.eq.s32.totalorder %v4166_v2, %v168_v21 }
 0x11b   :  { %v3094_v22 = vsel %vm172_vm7, 1.0, %v3923_v9 }
 0x11c   :  { %3320 = vmatprep.mubr.msk.f32.mxu0 %vm277_vm6, %v3094_v22 }
 0x11d   :  { %v171_v23 = vpop.permute.xlu0 %170 }
 0x11e   :  { %vm173_vm8 = vcmp.eq.s32.totalorder %v4166_v2, %v171_v23 }
 0x11f   :  { %v3095_v24 = vsel %vm173_vm8, 1.0, %v3923_v9 }
 0x120   :  { %3321 = vmatmul.mubr.msk.f32.vlgmr.msra.gmra.mrb[0].mxu0 %vm277_vm6, %v3095_v24  ;;  %v4257_v24 = vrot.slane %v423_v19, %v681_v16 }
 0x121   :  { %3341 = vmatprep.mubr.msk.f32.mxu0 %vm3925_vm10, %v3923_v9 }
 0x1f3   :  { %v3322_v26 = vpop.f32.mrb[0].mxu0 }
 0x1f4   :  { %v354_v27 = vpop.f32.mrb[1].mxu0  ;;  %v369_v29 = vadd.f32 %v3322_v26, %v3103_v25 }
 0x1f5   :  { %v368_v28 = vadd.f32 %v3103_v25, %v354_v27 }
 0x1f6   :  { %v376_v31 = vsel %vm372_vm9, %v369_v29, 0.0 }
 0x1f7   :  { %v373_v30 = vsel %vm372_vm9, %v368_v28, 0.0 }
 0x1f8   :  { %374 = vadd.xlane.f32.xlu1 %v373_v30 }
 0x1fc   :  { %377 = vadd.xlane.f32.xlu1 %v376_v31 }
 0x285   :  { %v375_v32 = vpop.xlane.xlu1 %374 }
 0x286   :  { %v380_v33 = vmul.f32 0.03125, %v375_v32 }
 0x288   :  { %v382_v34 = vsub.f32 %v368_v28, %v380_v33 }
 0x289   :  { %v378_v35 = vpop.xlane.xlu1 %377 }
 0x28a   :  { %v381_v36 = vmul.f32 0.03125, %v378_v35  ;;  %v384_v37 = vmul.f32 %v382_v34, %v382_v34 }
 0x28c   :  { %v383_v38 = vsub.f32 %v369_v29, %v381_v36  ;;  %v386_v39 = vsel %vm372_vm9, %v384_v37, 0.0 }
 0x28d   :  { %387 = vadd.xlane.f32.xlu0 %v386_v39 }
 0x28e   :  { %v385_v40 = vmul.f32 %v383_v38, %v383_v38 }
 0x290   :  { %v389_v41 = vsel %vm372_vm9, %v385_v40, 0.0 }
 0x291   :  { %390 = vadd.xlane.f32.xlu1 %v389_v41 }
 0x31a   :  { %v388_v48 = vpop.xlane.xlu0 %387 }
 0x31b   :  { %v392_v49 = vmul.f32 0.03125, %v388_v48 }
 0x31d   :  { %v394_v50 = vadd.f32 1e-12, %v392_v49 }
 0x31e   :  { %v391_v51 = vpop.xlane.xlu1 %390 }
 0x31f   :  { %3663 = vrsqrt.f32 %v394_v50  ;;  %v393_v52 = vmul.f32 0.03125, %v391_v51 }
 0x321   :  { %v395_v53 = vadd.f32 1e-12, %v393_v52 }
 0x323   :  { %3665 = vrsqrt.f32 %v395_v53 }
 0x329   :  { %v3664_v54 = vpop.eup %3663 }
 0x32a   :  { %v398_v56 = vmul.f32 %v3664_v54, %v382_v34 }
 0x32c   :  { %v406_v58 = vmul.f32 %v3104_v55, %v398_v56 }
 0x32d   :  { %v3666_v59 = vpop.eup %3665 }
 0x32e   :  { %v399_v60 = vmul.f32 %v3666_v59, %v383_v38  ;;  %v4212_v61 = vadd.f32 %v3105_v57, %v406_v58 }
 0x330   :  { %v407_v62 = vmul.f32 %v3104_v55, %v399_v60  ;;  %3331 = vmatprep.mubr.msk.f32.mxu1 %vm372_vm9, %v4212_v61 }
 0x332   :  { %v4216_v63 = vadd.f32 %v3105_v57, %v407_v62 }
 0x334   :  { %3332 = vmatmul.mubr.msk.f32.vlgmr.msra.gmra.mrb[0].mxu1 %vm372_vm9, %v4216_v63 }
 0x335   :  { %3336 = vmatprep.mubr.msk.f32.mxu1 %vm3925_vm10, %v3923_v9 }
 0x407   :  { %v3333_v1 = vpop.f32.mrb[0].mxu1 }
 0x408   :  { %v512_v4 = vpop.f32.mrb[1].mxu1  ;;  %v4231_v6 = vadd.f32 %v3333_v1, %v3106_v0 }
 0x409   :  { %v4227_v5 = vadd.f32 %v3106_v0, %v512_v4 }
 0x40b   :  { %522 = vrot.lane.b32.xlu1 %v4227_v5, %s3926_s19 }
 0x40f   :  { %599 = vrot.lane.b32.xlu1 %v4231_v6, %s3926_s19 }
 0x47d   :  { %v523_v7 = vpop.permute.xlu1 %522 }
 0x47e   :  { %3335 = vmatpush3.xpose.msk.msra.mxu1 %vm195_vm0, %v523_v7 }
 0x47f   :  { %3344 = vmatprep.subr.mxu1 %v3923_v9 }
 0x481   :  { %3337 = vmatmul.mubr.msk.f32.vlgmr.msra.gmra.mrb[2].mxu1 %vm195_vm0, %v4227_v5  ;;  %v600_v8 = vpop.permute.xlu1 %599 }
 0x482   :  { %3340 = vmatpush3.xpose.msk.msra.mxu0 %vm195_vm0, %v600_v8  ;;  %3346 = vmatprep.mubr.msk.f32.mxu1 %vm3925_vm10, %v3923_v9 }
 0x483   :  { %3349 = vmatprep.subr.mxu0 %v3923_v9 }
 0x485   :  { %3342 = vmatmul.mubr.msk.f32.vlgmr.msra.gmra.mrb[2].mxu0 %vm195_vm0, %v4231_v6 }
 0x486   :  { %3351 = vmatprep.mubr.msk.f32.mxu0 %vm3925_vm10, %v3923_v9 }
 0x554   :  { %v594_v20 = vpop.f32.mrb[2].mxu1 }
 0x555   :  { %v675_v21 = vmul.f32 0.25, %v594_v20  ;;  %v3338_v22 = vpop.f32.mrb[3].mxu1 }
 0x557   :  { %v689_v23 = vadd.f32 %v4254_v18, %v675_v21 }
 0x558   :  { %v671_v25 = vpop.f32.mrb[2].mxu0 }
 0x559   :  { %v676_v26 = vmul.f32 0.25, %v671_v25  ;;  %v3343_v27 = vpop.f32.mrb[3].mxu0  ;;  %v692_v28 = vsel %vm691_vm11, %v689_v23, -inf }
 0x55a   :  { %693 = vmax.xlane.f32.xlu1 %v692_v28 }
 0x55b   :  { %v690_v29 = vadd.f32 %v4257_v24, %v676_v26 }
 0x55d   :  { %v695_v30 = vsel %vm691_vm11, %v690_v29, -inf }
 0x55e   :  { %696 = vmax.xlane.f32.xlu0 %v695_v30 }
 0x56b   :  { %790 = vrot.lane.b32.xlu1 %v4231_v6, %s3927_s6 }
 0x574   :  { %714 = vrot.lane.b32.xlu0 %v4227_v5, %s3927_s6 }
 0x578   :  { %868 = vrot.lane.b32.xlu0 %v4227_v5, %s3928_s2 }
 0x57c   :  { %946 = vrot.lane.b32.xlu0 %v4231_v6, %s3928_s2 }
 0x5e7   :  { %v694_v31 = vpop.xlane.xlu1 %693 }
 0x5e8   :  { %v698_v32 = vsub.f32 %v689_v23, %v694_v31  ;;  %v429_v31 = vld [vmem:[%s4595_s9] sm:$0xff] }
 0x5ea   :  { %v700_v36 = vmul.f32 1.442695, %v698_v32  ;;  %v430_v32 = vld [vmem:[%s4595_s9 + $0x8] sm:$0xff] }
 0x5eb   :  { %v697_v33 = vpop.xlane.xlu0 %696  ;;  %v791_v34 = vpop.permute.xlu1 %790 }
 0x5ec   :  { %v699_v35 = vsub.f32 %v690_v29, %v697_v33  ;;  %3350 = vmatpush3.msra.mxu0 %v791_v34  ;;  %v3557_v33 = vpack.c.bf16 %v430_v32, %v429_v31  ;;  %v3128_v32 = vld [vmem:[#allocation11] ss:$0 sm:$0xff] }
 0x5ed   :  { %3359 = vmatprep.subr.mxu0 %v3923_v9 }
 0x5ee   :  { %v702_v37 = vmul.f32 1.442695, %v699_v35 }
 0x5ef   :  { %v715_v38 = vpop.permute.xlu0 %714 }
 0x5f0   :  { %3667 = vpow2.f32 %v702_v37  ;;  %3345 = vmatpush3.msra.mxu1 %v715_v38  ;;  %v3125_v38 = vld [vmem:[%s4596_s10] ss:$0 sm:$0xff] }
 0x5f1   :  { %3354 = vmatprep.subr.mxu1 %v3923_v9  ;;  %3669 = vpow2.f32 %v700_v36 }
 0x5f3   :  { %v869_v43 = vpop.permute.xlu0 %868 }
 0x5f7   :  { %v947_v44 = vpop.permute.xlu0 %946 }
 0x5fa   :  { %v3668_v39 = vpop.eup %3667 }
 0x5fb   :  { %v707_v40 = vsel %vm691_vm11, %v3668_v39, 0.0  ;;  %v3670_v41 = vpop.eup %3669 }
 0x5fc   :  { %708 = vadd.xlane.f32.xlu0 %v707_v40  ;;  %v704_v42 = vsel %vm691_vm11, %v3670_v41, 0.0 }
 0x600   :  { %705 = vadd.xlane.f32.xlu0 %v704_v42 }
 0x616   :  { %866 = vrot.lane.b32.xlu0 %v4227_v5, %s3929_s22 }
 0x61a   :  { %944 = vrot.lane.b32.xlu0 %v4231_v6, %s3929_s22 }
 0x689   :  { %v709_v45 = vpop.xlane.xlu0 %708 }
 0x68a   :  { %3671 = vrcp.f32 %v709_v45 }
 0x68d   :  { %v706_v46 = vpop.xlane.xlu0 %705 }
 0x68e   :  { %3673 = vrcp.f32 %v706_v46 }
 0x691   :  { %v867_v48 = vpop.permute.xlu0 %866 }
 0x694   :  { %v3672_v47 = vpop.eup %3671 }
 0x695   :  { %v713_v49 = vmul.f32 %v3672_v47, %v3668_v39  ;;  %v945_v52 = vpop.permute.xlu0 %944 }
 0x697   :  { %3352 = vmatmul.mubr.msk.f32.vlgmr.msra.gmra.mrb[4].mxu0 %vm691_vm11, %v713_v49 }
 0x698   :  { %v3674_v50 = vpop.eup %3673  ;;  %3360 = vmatpush3.xpose.msk.msra.mxu0 %vm195_vm0, %v947_v44  ;;  %3361 = vmatprep.mubr.msk.f32.mxu0 %vm3925_vm10, %v3923_v9 }
 0x699   :  { %v712_v51 = vmul.f32 %v3674_v50, %v3670_v41  ;;  %3369 = vmatprep.subr.mxu0 %v3923_v9 }
 0x69b   :  { %3347 = vmatmul.mubr.msk.f32.vlgmr.msra.gmra.mrb[4].mxu1 %vm691_vm11, %v712_v51  ;;  %3362 = vmatmul.mubr.msk.f32.vlgmr.msra.gmra.mrb[6].mxu0 %vm195_vm0, %v945_v52 }
 0x69c   :  { %3355 = vmatpush3.xpose.msk.msra.mxu1 %vm195_vm0, %v869_v43  ;;  %3356 = vmatprep.mubr.msk.f32.mxu1 %vm3925_vm10, %v3923_v9 }
 0x69d   :  { %3364 = vmatprep.subr.mxu1 %v3923_v9  ;;  %3371 = vmatprep.mubr.msk.f32.mxu0 %vm3925_vm10, %v3923_v9 }
 0x69f   :  { %3357 = vmatmul.mubr.msk.f32.vlgmr.msra.gmra.mrb[6].mxu1 %vm195_vm0, %v867_v48 }
 0x6a0   :  { %3366 = vmatprep.mubr.msk.f32.mxu1 %vm3925_vm10, %v3923_v9 }
 0x76a   :  { %v4294_v53 = vpop.f32.mrb[4].mxu0 }
 0x76b   :  { %v3353_v54 = vpop.f32.mrb[5].mxu0 }
 0x76e   :  { %v786_v55 = vpop.f32.mrb[4].mxu1  ;;  %v1018_v56 = vpop.f32.mrb[6].mxu0 }
 0x76f   :  { %v1023_v57 = vmul.f32 0.25, %v1018_v56  ;;  %v3348_v58 = vpop.f32.mrb[5].mxu1  ;;  %v3363_v59 = vpop.f32.mrb[7].mxu0  ;;  %v1417_v56 = vld [vmem:[%s4599_s13 + $0x8] sm:$0xff] }
 0x770   :  { %v1418_v58 = vld [vmem:[%s4599_s13 + $0x10] sm:$0xff]  ;;  %v1419_v59 = vld [vmem:[%s4599_s13 + $0x18] sm:$0xff] }
 0x771   :  { %v1025_v60 = vadd.f32 %v1023_v57, %v4257_v24 }
 0x772   :  { %v940_v62 = vpop.f32.mrb[6].mxu1 }
 0x773   :  { %v1022_v0 = vmul.f32 0.25, %v940_v62  ;;  %v3358_v1 = vpop.f32.mrb[7].mxu1  ;;  %v1029_v4 = vsel %vm691_vm11, %v1025_v60, -inf }
 0x774   :  { %1030 = vmax.xlane.f32.xlu0 %v1029_v4 }
 0x775   :  { %v1024_v7 = vadd.f32 %v1022_v0, %v4254_v18 }
 0x777   :  { %v1026_v8 = vsel %vm691_vm11, %v1024_v7, -inf }
 0x778   :  { %1027 = vmax.xlane.f32.xlu1 %v1026_v8 }
 0x801   :  { %v1031_v10 = vpop.xlane.xlu0 %1030 }
 0x802   :  { %v1033_v11 = vsub.f32 %v1025_v60, %v1031_v10  ;;  %v3565_v60 = vpack.c.bf16 %v1419_v59, %v1418_v58 }
 0x804   :  { %v1036_v12 = vmul.f32 1.442695, %v1033_v11  ;;  %v3126_v11 = vld [vmem:[#allocation8] ss:$0 sm:$0xff] }
 0x805   :  { %v1028_v13 = vpop.xlane.xlu1 %1027 }
 0x806   :  { %3675 = vpow2.f32 %v1036_v12  ;;  %v1032_v14 = vsub.f32 %v1024_v7, %v1028_v13 }
 0x808   :  { %v1034_v15 = vmul.f32 1.442695, %v1032_v14 }
 0x80a   :  { %3677 = vpow2.f32 %v1034_v15  ;;  %v3127_v15 = vld [vmem:[#allocation10] ss:$0 sm:$0xff] }
 0x810   :  { %v3676_v16 = vpop.eup %3675 }
 0x811   :  { %v1041_v17 = vsel %vm691_vm11, %v3676_v16, 0.0 }
 0x812   :  { %1042 = vadd.xlane.f32.xlu1 %v1041_v17 }
 0x814   :  { %v3678_v19 = vpop.eup %3677 }
 0x815   :  { %v1038_v20 = vsel %vm691_vm11, %v3678_v19, 0.0 }
 0x816   :  { %1039 = vadd.xlane.f32.xlu0 %v1038_v20 }
 0x823   :  { %1124 = vrot.lane.b32.xlu1 %v4231_v6, %s3930_s4  ;;  %v432_v6 = vld [vmem:[%s4595_s9 + $0x18] sm:$0xff] }
 0x82c   :  { %1048 = vrot.lane.b32.xlu0 %v4227_v5, %s3930_s4  ;;  %v431_v5 = vld [vmem:[%s4595_s9 + $0x10] sm:$0xff] }
 0x82d   :  { %v3553_v30 = vpack.c.bf16 %v432_v6, %v431_v5  ;;  %v1532_v6 = vld [vmem:[%s4601_s15 + $0x30] sm:$0xff] }
 0x89f   :  { %v1043_v21 = vpop.xlane.xlu1 %1042 }
 0x8a0   :  { %3679 = vrcp.f32 %v1043_v21  ;;  %v1526_v21 = vld [vmem:[%s4601_s15] sm:$0xff] }
 0x8a3   :  { %v1040_v22 = vpop.xlane.xlu0 %1039  ;;  %v1125_v23 = vpop.permute.xlu1 %1124 }
 0x8a4   :  { %3681 = vrcp.f32 %v1040_v22  ;;  %3370 = vmatpush3.msra.mxu0 %v1125_v23  ;;  %v1527_v22 = vld [vmem:[%s4601_s15 + $0x8] sm:$0xff] }
 0x8a5   :  { %v3569_v23 = vpack.c.bf16 %v1527_v22, %v1526_v21 }
 0x8a7   :  { %v1049_v25 = vpop.permute.xlu0 %1048 }
 0x8a8   :  { %3365 = vmatpush3.msra.mxu1 %v1049_v25  ;;  %v1528_v25 = vld [vmem:[%s4601_s15 + $0x10] sm:$0xff] }
 0x8a9   :  { %3554 = vmatprep.subr.bf16.mxu1 %v3553_v30 }
 0x8aa   :  { %v3680_v26 = vpop.eup %3679 }
 0x8ab   :  { %v1047_v27 = vmul.f32 %v3680_v26, %v3676_v16  ;;  %v1529_v26 = vld [vmem:[%s4601_s15 + $0x18] sm:$0xff] }
 0x8ad   :  { %3372 = vmatmul.mubr.msk.f32.vlgmr.msra.gmra.mrb[8].mxu0 %vm691_vm11, %v1047_v27  ;;  %v3573_v27 = vpack.c.bf16 %v1529_v26, %v1528_v25 }
 0x8ae   :  { %v3682_v28 = vpop.eup %3681 }
 0x8af   :  { %v1046_v29 = vmul.f32 %v3682_v28, %v3678_v19  ;;  %v1530_v28 = vld [vmem:[%s4601_s15 + $0x20] sm:$0xff] }
 0x8b1   :  { %3367 = vmatmul.mubr.msk.f32.vlgmr.msra.gmra.mrb[8].mxu1 %vm691_vm11, %v1046_v29  ;;  %v1531_v29 = vld [vmem:[%s4601_s15 + $0x28] sm:$0xff] }
 0x8b2   :  { %3556 = vmatpush3.bf16.msra.mxu1 %v3553_v30  ;;  %v3577_v5 = vpack.c.bf16 %v1531_v29, %v1530_v28  ;;  %v1533_v30 = vld [vmem:[%s4601_s15 + $0x38] sm:$0xff] }
 0x8b3   :  { %3558 = vmatprep.subr.bf16.mxu1 %v3557_v33  ;;  %v3581_v31 = vpack.c.bf16 %v1533_v30, %v1532_v6 }
 0x980   :  { %v1196_v34 = vpop.f32.mrb[8].mxu0 }
 0x981   :  { %v3373_v35 = vpop.f32.mrb[9].mxu0 }
 0x984   :  { %v1120_v36 = vpop.f32.mrb[8].mxu1 }
 0x985   :  { %v3368_v37 = vpop.f32.mrb[9].mxu1  ;;  %3378 = vmatprep.mubr.msk.f32.mxu1 %vm195_vm0, %v1120_v36 }
 0x986   :  { %3379 = vmatmul.mubr.msk.f32.vlgmr.msra.gmra.mrb[10].mxu1 %vm195_vm0, %v1196_v34 }
 0x987   :  { %3560 = vmatpush3.bf16.msra.mxu1 %v3557_v33  ;;  %3385 = vmatprep.mubr.msk.f32.mxu1 %vm195_vm0, %v786_v55 }
 0x988   :  { %3570 = vmatprep.subr.bf16.mxu1 %v3569_v23 }
 0x98e   :  { %3386 = vmatmul.mubr.msk.f32.vlgmr.msra.gmra.mrb[10].mxu1 %vm195_vm0, %v4294_v53 }
 0x98f   :  { %3572 = vmatpush3.bf16.msra.mxu1 %v3569_v23 }
 0x990   :  { %3574 = vmatprep.subr.bf16.mxu1 %v3573_v27 }
 0x993   :  { %3576 = vmatpush3.bf16.msra.mxu1 %v3573_v27 }
 0x994   :  { %3578 = vmatprep.subr.bf16.mxu1 %v3577_v5 }
 0x997   :  { %3580 = vmatpush3.bf16.msra.mxu1 %v3577_v5  ;;  %v3134_v5 = vld [vmem:[%s4603_s17] ss:$0 sm:$0xff] }
 0x998   :  { %3582 = vmatprep.subr.bf16.mxu1 %v3581_v31 }
 0x99b   :  { %3584 = vmatpush3.bf16.msra.mxu1 %v3581_v31 }
 0x99c   :  { %3439 = vmatprep.subr.mxu1 %v3923_v9 }
 0xa61   :  { %v3387_v39 = vpop.f32.mrb[10].mxu1 }
 0xa62   :  { %v1369_v40 = vadd.f32 %v3387_v39, %v3125_v38  ;;  %v1353_v41 = vpop.f32.mrb[11].mxu1 }
 0xa63   :  { %v1368_v42 = vadd.f32 %v3125_v38, %v1353_v41 }
 0xa64   :  { %v1371_v43 = vadd.f32 %v1369_v40, %v4216_v63 }
 0xa65   :  { %v1370_v44 = vadd.f32 %v1368_v42, %v4212_v61  ;;  %v1416_v61 = vld [vmem:[%s4599_s13] sm:$0xff] }
 0xa66   :  { %v1377_v45 = vsel %vm372_vm9, %v1371_v43, 0.0  ;;  %v3561_v57 = vpack.c.bf16 %v1417_v56, %v1416_v61 }
 0xa67   :  { %1378 = vadd.xlane.f32.xlu0 %v1377_v45  ;;  %v1374_v46 = vsel %vm372_vm9, %v1370_v44, 0.0 }
 0xa68   :  { %1375 = vadd.xlane.f32.xlu1 %v1374_v46  ;;  %3562 = vmatprep.subr.bf16.mxu0 %v3561_v57 }
 0xa69   :  { %3564 = vmatpush3.bf16.msra.mxu0 %v3561_v57 }
 0xa6a   :  { %3566 = vmatprep.subr.bf16.mxu0 %v3565_v60 }
 0xa6d   :  { %3568 = vmatpush3.bf16.msra.mxu0 %v3565_v60 }
 0xaf4   :  { %v1379_v47 = vpop.xlane.xlu0 %1378 }
 0xaf5   :  { %v1381_v48 = vmul.f32 0.03125, %v1379_v47  ;;  %v1376_v49 = vpop.xlane.xlu1 %1375 }
 0xaf6   :  { %v1380_v50 = vmul.f32 0.03125, %v1376_v49 }
 0xaf7   :  { %v1383_v51 = vsub.f32 %v1371_v43, %v1381_v48 }
 0xaf8   :  { %v1382_v52 = vsub.f32 %v1370_v44, %v1380_v50 }
 0xaf9   :  { %v1385_v53 = vmul.f32 %v1383_v51, %v1383_v51 }
 0xafa   :  { %v1384_v54 = vmul.f32 %v1382_v52, %v1382_v52 }
 0xafb   :  { %v1389_v55 = vsel %vm372_vm9, %v1385_v53, 0.0 }
 0xafc   :  { %1390 = vadd.xlane.f32.xlu1 %v1389_v55  ;;  %v1386_v63 = vsel %vm372_vm9, %v1384_v54, 0.0  ;;  %v3131_v55 = vld [vmem:[%s4602_s16] ss:$0 sm:$0xff] }
 0xafd   :  { %1387 = vadd.xlane.f32.xlu0 %v1386_v63 }
 0xb89   :  { %v1391_v62 = vpop.xlane.xlu1 %1390 }
 0xb8a   :  { %v1393_v0 = vmul.f32 0.03125, %v1391_v62  ;;  %v1388_v1 = vpop.xlane.xlu0 %1387 }
 0xb8b   :  { %v1392_v4 = vmul.f32 0.03125, %v1388_v1 }
 0xb8c   :  { %v1395_v7 = vadd.f32 1e-12, %v1393_v0 }
 0xb8d   :  { %v1394_v8 = vadd.f32 1e-12, %v1392_v4 }
 0xb8e   :  { %3683 = vrsqrt.f32 %v1395_v7 }
 0xb8f   :  { %3685 = vrsqrt.f32 %v1394_v8 }
 0xb98   :  { %v3684_v10 = vpop.eup %3683 }
 0xb99   :  { %v3686_v12 = vpop.eup %3685  ;;  %v1399_v13 = vmul.f32 %v3684_v10, %v1383_v51 }
 0xb9a   :  { %v1398_v14 = vmul.f32 %v3686_v12, %v1382_v52 }
 0xb9b   :  { %v1407_v16 = vmul.f32 %v3126_v11, %v1399_v13 }
 0xb9c   :  { %v1406_v17 = vmul.f32 %v3126_v11, %v1398_v14 }
 0xb9d   :  { %v1415_v20 = vadd.f32 %v3127_v15, %v1407_v16  ;;  %v3137_v16 = vld [vmem:[%s4593_s7 + $0x28] sm:$0xff] }
 0xb9e   :  { %v1414_v19 = vadd.f32 %v3127_v15, %v1406_v17  ;;  %v3136_v15 = vld [vmem:[%s4593_s7 + $0x20] sm:$0xff] }
 0xb9f   :  { %v3585_v17 = vpack.c.bf16 %v3137_v16, %v3136_v15 }
 0xba0   :  { %3396 = vmatprep.mubr.msk.f32.mxu0 %vm372_vm9, %v1414_v19 }
 0xba1   :  { %3397 = vmatmul.mubr.msk.f32.vlgmr.msra.gmra.mrb[10].mxu0 %vm372_vm9, %v1415_v20  ;;  %3586 = vmatprep.subr.bf16.mxu0 %v3585_v17 }
 0xba2   :  { %3588 = vmatpush3.bf16.msra.mxu0 %v3585_v17 }
 0xc74   :  { %v3398_v33 = vpop.f32.mrb[10].mxu0 }
 0xc75   :  { %v1505_v34 = vadd.f32 %v3398_v33, %v3128_v32  ;;  %v1499_v35 = vpop.f32.mrb[11].mxu0 }
 0xc76   :  { %v1500_v36 = vadd.f32 %v3128_v32, %v1499_v35  ;;  %v3135_v32 = vld [vmem:[%s4604_s18] ss:$0 sm:$0xff] }
 0xc77   :  { %v1511_v37 = vmul.f32 0.044715, %v1505_v34  ;;  %v1509_v52 = vmul.f32 0.5, %v1505_v34 }
 0xc78   :  { %v1510_v38 = vmul.f32 0.044715, %v1500_v36  ;;  %v1508_v50 = vmul.f32 0.5, %v1500_v36 }
 0xc79   :  { %v1513_v39 = vmul.f32 %v1511_v37, %v1505_v34  ;;  %v3146_v37 = vld [vmem:[%s4594_s8 + $0x1] ss:$0 sm:$0xff] }
 0xc7a   :  { %v1512_v40 = vmul.f32 %v1510_v38, %v1500_v36 }
 0xc7b   :  { %v1515_v41 = vmul.f32 %v1513_v39, %v1505_v34 }
 0xc7c   :  { %v1514_v42 = vmul.f32 %v1512_v40, %v1500_v36 }
 0xc7d   :  { %v1517_v43 = vadd.f32 %v1515_v41, %v1505_v34 }
 0xc7e   :  { %v1516_v44 = vadd.f32 %v1514_v42, %v1500_v36 }
 0xc7f   :  { %v1519_v45 = vmul.f32 0.7978846, %v1517_v43 }
 0xc80   :  { %v1518_v46 = vmul.f32 0.7978846, %v1516_v44 }
 0xc81   :  { %3687 = vtanh.f32 %v1519_v45 }
 0xc82   :  { %3689 = vtanh.f32 %v1518_v46 }
 0xc8b   :  { %v3688_v47 = vpop.eup %3687 }
 0xc8c   :  { %v3690_v48 = vpop.eup %3689  ;;  %v1523_v49 = vadd.f32 1.0, %v3688_v47 }
 0xc8d   :  { %v1522_v51 = vadd.f32 1.0, %v3690_v48 }
 0xc8e   :  { %v1525_v54 = vmul.f32 %v1523_v49, %v1509_v52 }
 0xc8f   :  { %v1524_v53 = vmul.f32 %v1522_v51, %v1508_v50 }
 0xc91   :  { %3415 = vmatprep.mubr.msk.f32.mxu1 %vm1541_vm12, %v1524_v53 }
 0xc92   :  { %3416 = vmatmul.mubr.msk.f32.vlgmr.msra.gmra.mrb[12].mxu1 %vm1541_vm12, %v1525_v54 }
 0xc93   :  { %3441 = vmatprep.mubr.msk.f32.mxu1 %vm3925_vm10, %v3923_v9 }
 0xd65   :  { %v3417_v63 = vpop.f32.mrb[12].mxu1 }
 0xd66   :  { %v1620_v61 = vadd.f32 %v3417_v63, %v3131_v55  ;;  %v1614_v56 = vpop.f32.mrb[13].mxu1 }
 0xd67   :  { %v1615_v57 = vadd.f32 %v3131_v55, %v1614_v56 }
 0xd68   :  { %v1624_v58 = vadd.f32 %v1620_v61, %v1415_v20  ;;  %v3139_v20 = vld [vmem:[%s4593_s7 + $0x38] sm:$0xff] }
 0xd69   :  { %v1623_v59 = vadd.f32 %v1615_v57, %v1414_v19  ;;  %v3138_v19 = vld [vmem:[%s4593_s7 + $0x30] sm:$0xff] }
 0xd6a   :  { %v1630_v60 = vsel %vm372_vm9, %v1624_v58, 0.0  ;;  %v3589_v21 = vpack.c.bf16 %v3139_v20, %v3138_v19 }
 0xd6b   :  { %1631 = vadd.xlane.f32.xlu1 %v1630_v60  ;;  %v1627_v62 = vsel %vm372_vm9, %v1623_v59, 0.0 }
 0xd6c   :  { %1628 = vadd.xlane.f32.xlu0 %v1627_v62  ;;  %3590 = vmatprep.subr.bf16.mxu0 %v3589_v21 }
 0xd6d   :  { %3592 = vmatpush3.bf16.msra.mxu0 %v3589_v21 }
 0xd6e   :  { %3429 = vmatprep.subr.mxu0 %v3923_v9 }
 0xdf8   :  { %v1632_v0 = vpop.xlane.xlu1 %1631 }
 0xdf9   :  { %v1634_v1 = vmul.f32 0.03125, %v1632_v0  ;;  %v1629_v4 = vpop.xlane.xlu0 %1628 }
 0xdfa   :  { %v1633_v7 = vmul.f32 0.03125, %v1629_v4 }
 0xdfb   :  { %v1636_v8 = vsub.f32 %v1624_v58, %v1634_v1 }
 0xdfc   :  { %v1635_v10 = vsub.f32 %v1623_v59, %v1633_v7 }
 0xdfd   :  { %v1638_v11 = vmul.f32 %v1636_v8, %v1636_v8 }
 0xdfe   :  { %v1637_v12 = vmul.f32 %v1635_v10, %v1635_v10 }
 0xdff   :  { %v1642_v13 = vsel %vm372_vm9, %v1638_v11, 0.0 }
 0xe00   :  { %1643 = vadd.xlane.f32.xlu1 %v1642_v13  ;;  %v1639_v14 = vsel %vm372_vm9, %v1637_v12, 0.0 }
 0xe01   :  { %1640 = vadd.xlane.f32.xlu0 %v1639_v14 }
 0xe8d   :  { %v1644_v22 = vpop.xlane.xlu1 %1643 }
 0xe8e   :  { %v1646_v23 = vmul.f32 0.03125, %v1644_v22  ;;  %v1641_v25 = vpop.xlane.xlu0 %1640 }
 0xe8f   :  { %v1645_v26 = vmul.f32 0.03125, %v1641_v25 }
 0xe90   :  { %v1648_v27 = vadd.f32 1e-12, %v1646_v23 }
 0xe91   :  { %v1647_v28 = vadd.f32 1e-12, %v1645_v26 }
 0xe92   :  { %3691 = vrsqrt.f32 %v1648_v27 }
 0xe93   :  { %3693 = vrsqrt.f32 %v1647_v28 }
 0xe9c   :  { %v3692_v29 = vpop.eup %3691 }
 0xe9d   :  { %v3694_v6 = vpop.eup %3693  ;;  %v1652_v30 = vmul.f32 %v3692_v29, %v1636_v8 }
 0xe9e   :  { %v1651_v31 = vmul.f32 %v3694_v6, %v1635_v10 }
 0xe9f   :  { %v1660_v33 = vmul.f32 %v3134_v5, %v1652_v30 }
 0xea0   :  { %v1659_v34 = vmul.f32 %v3134_v5, %v1651_v31 }
 0xea1   :  { %v4405_v36 = vadd.f32 %v3135_v32, %v1660_v33 }
 0xea2   :  { %v4403_v35 = vadd.f32 %v3135_v32, %v1659_v34 }
 0xea4   :  { %3426 = vmatprep.mubr.msk.f32.mxu0 %vm372_vm9, %v4403_v35 }
 0xea5   :  { %3427 = vmatmul.mubr.msk.f32.vlgmr.msra.gmra.mrb[12].mxu0 %vm372_vm9, %v4405_v36 }
 0xea6   :  { %3431 = vmatprep.mubr.msk.f32.mxu0 %vm3925_vm10, %v3923_v9 }
 0xf78   :  { %v3428_v38 = vpop.f32.mrb[12].mxu0 }
 0xf79   :  { %v4416_v39 = vadd.f32 %v3428_v38, %v3146_v37  ;;  %v1761_v40 = vpop.f32.mrb[13].mxu0 }
 0xf7a   :  { %v4418_v41 = vadd.f32 %v3146_v37, %v1761_v40 }
 0xf7b   :  { %1848 = vrot.lane.b32.xlu1 %v4416_v39, %s3926_s19 }
 0xf7c   :  { %1771 = vrot.lane.b32.xlu0 %v4418_v41, %s3926_s19 }
 0xfed   :  { %v1849_v43 = vpop.permute.xlu1 %1848 }
 0xfee   :  { %v1772_v42 = vpop.permute.xlu0 %1771 }
 0xfef   :  { %3430 = vmatpush3.xpose.msk.msra.mxu0 %vm195_vm0, %v1772_v42 }
 0xff0   :  { %3434 = vmatprep.subr.mxu0 %v3923_v9 }
 0xff2   :  { %3432 = vmatmul.mubr.msk.f32.vlgmr.msra.gmra.mrb[14].mxu0 %vm195_vm0, %v4418_v41 }
 0xff3   :  { %3435 = vmatpush3.xpose.msk.msra.mxu0 %vm195_vm0, %v1849_v43  ;;  %3436 = vmatprep.mubr.msk.f32.mxu0 %vm3925_vm10, %v3923_v9 }
 0xff4   :  { %3444 = vmatprep.subr.mxu0 %v3923_v9 }
 0xff6   :  { %3437 = vmatmul.mubr.msk.f32.vlgmr.msra.gmra.mrb[16].mxu0 %vm195_vm0, %v4416_v39 }
 0xff7   :  { %3446 = vmatprep.mubr.msk.f32.mxu0 %vm3925_vm10, %v3923_v9 }
0x10c5   :  { %v1843_v44 = vpop.f32.mrb[14].mxu0 }
0x10c6   :  { %v1924_v45 = vmul.f32 0.25, %v1843_v44  ;;  %v3433_v46 = vpop.f32.mrb[15].mxu0 }
0x10c8   :  { %v1926_v47 = vadd.f32 %v1924_v45, %v4254_v18 }
0x10c9   :  { %v1920_v48 = vpop.f32.mrb[16].mxu0 }
0x10ca   :  { %v1925_v49 = vmul.f32 0.25, %v1920_v48  ;;  %v3438_v50 = vpop.f32.mrb[17].mxu0  ;;  %v1928_v51 = vsel %vm691_vm11, %v1926_v47, -inf }
0x10cb   :  { %1929 = vmax.xlane.f32.xlu1 %v1928_v51 }
0x10cc   :  { %v1927_v52 = vadd.f32 %v1925_v49, %v4257_v24 }
0x10ce   :  { %v1931_v53 = vsel %vm691_vm11, %v1927_v52, -inf }
0x10cf   :  { %1932 = vmax.xlane.f32.xlu0 %v1931_v53  ;;  %v3142_v53 = vld [vmem:[%s4595_s9 + $0x28] sm:$0xff] }
0x10dc   :  { %2026 = vrot.lane.b32.xlu1 %v4416_v39, %s3927_s6 }
0x10e0   :  { %2104 = vrot.lane.b32.xlu1 %v4418_v41, %s3928_s2 }
0x10e5   :  { %1950 = vrot.lane.b32.xlu0 %v4418_v41, %s3927_s6 }
0x1158   :  { %v1930_v54 = vpop.xlane.xlu1 %1929 }
0x1159   :  { %v1934_v55 = vsub.f32 %v1926_v47, %v1930_v54 }
0x115b   :  { %v1936_v63 = vmul.f32 1.442695, %v1934_v55 }
0x115c   :  { %v2027_v61 = vpop.permute.xlu1 %2026  ;;  %v1933_v56 = vpop.xlane.xlu0 %1932 }
0x115d   :  { %3695 = vpow2.f32 %v1936_v63  ;;  %v1935_v57 = vsub.f32 %v1927_v52, %v1933_v56  ;;  %3445 = vmatpush3.msra.mxu0 %v2027_v61  ;;  %v3141_v52 = vld [vmem:[%s4595_s9 + $0x20] sm:$0xff] }
0x115e   :  { %3454 = vmatprep.subr.mxu0 %v3923_v9  ;;  %v3597_v54 = vpack.c.bf16 %v3142_v53, %v3141_v52 }
0x115f   :  { %v1938_v58 = vmul.f32 1.442695, %v1935_v57  ;;  %v3165_v57 = vld [vmem:[%s4596_s10 + $0x1] ss:$0 sm:$0xff] }
0x1160   :  { %v1951_v59 = vpop.permute.xlu0 %1950  ;;  %v2105_v4 = vpop.permute.xlu1 %2104 }
0x1161   :  { %3697 = vpow2.f32 %v1938_v58  ;;  %3440 = vmatpush3.msra.mxu1 %v1951_v59 }
0x1162   :  { %3449 = vmatprep.subr.mxu1 %v3923_v9 }
0x1167   :  { %v3696_v60 = vpop.eup %3695 }
0x1168   :  { %v1940_v62 = vsel %vm691_vm11, %v3696_v60, 0.0 }
0x1169   :  { %1941 = vadd.xlane.f32.xlu0 %v1940_v62 }
0x116b   :  { %v3698_v0 = vpop.eup %3697 }
0x116c   :  { %v1943_v1 = vsel %vm691_vm11, %v3698_v0, 0.0 }
0x116d   :  { %1944 = vadd.xlane.f32.xlu1 %v1943_v1 }
0x117e   :  { %2102 = vrot.lane.b32.xlu1 %v4418_v41, %s3929_s22 }
0x117f   :  { %2182 = vrot.lane.b32.xlu0 %v4416_v39, %s3928_s2 }
0x1183   :  { %2180 = vrot.lane.b32.xlu0 %v4416_v39, %s3929_s22 }
0x11f6   :  { %v1942_v7 = vpop.xlane.xlu0 %1941 }
0x11f7   :  { %3699 = vrcp.f32 %v1942_v7 }
0x11fa   :  { %v1945_v8 = vpop.xlane.xlu1 %1944  ;;  %v2183_v13 = vpop.permute.xlu0 %2182 }
0x11fb   :  { %3701 = vrcp.f32 %v1945_v8 }
0x11fe   :  { %v2103_v15 = vpop.permute.xlu1 %2102  ;;  %v2181_v16 = vpop.permute.xlu0 %2180 }
0x1201   :  { %v3700_v10 = vpop.eup %3699 }
0x1202   :  { %v1948_v11 = vmul.f32 %v3700_v10, %v3696_v60 }
0x1204   :  { %3442 = vmatmul.mubr.msk.f32.vlgmr.msra.gmra.mrb[14].mxu1 %vm691_vm11, %v1948_v11 }
0x1205   :  { %v3702_v12 = vpop.eup %3701  ;;  %3450 = vmatpush3.xpose.msk.msra.mxu1 %vm195_vm0, %v2105_v4  ;;  %3451 = vmatprep.mubr.msk.f32.mxu1 %vm3925_vm10, %v3923_v9 }
0x1206   :  { %v1949_v14 = vmul.f32 %v3702_v12, %v3698_v0  ;;  %3459 = vmatprep.subr.mxu1 %v3923_v9 }
0x1208   :  { %3447 = vmatmul.mubr.msk.f32.vlgmr.msra.gmra.mrb[18].mxu0 %vm691_vm11, %v1949_v14  ;;  %3452 = vmatmul.mubr.msk.f32.vlgmr.msra.gmra.mrb[16].mxu1 %vm195_vm0, %v2103_v15 }
0x1209   :  { %3455 = vmatpush3.xpose.msk.msra.mxu0 %vm195_vm0, %v2183_v13  ;;  %3456 = vmatprep.mubr.msk.f32.mxu0 %vm3925_vm10, %v3923_v9 }
0x120a   :  { %3464 = vmatprep.subr.mxu0 %v3923_v9  ;;  %3461 = vmatprep.mubr.msk.f32.mxu1 %vm3925_vm10, %v3923_v9 }
0x120c   :  { %3457 = vmatmul.mubr.msk.f32.vlgmr.msra.gmra.mrb[20].mxu0 %vm195_vm0, %v2181_v16 }
0x120d   :  { %3466 = vmatprep.mubr.msk.f32.mxu0 %vm3925_vm10, %v3923_v9 }
0x12d7   :  { %v2022_v17 = vpop.f32.mrb[14].mxu1 }
0x12d8   :  { %v3443_v19 = vpop.f32.mrb[15].mxu1 }
0x12d9   :  { %v3169_v19 = vld [vmem:[%s4599_s13 + $0x28] sm:$0xff] }
0x12db   :  { %v2098_v20 = vpop.f32.mrb[18].mxu0  ;;  %v2176_v21 = vpop.f32.mrb[16].mxu1 }
0x12dc   :  { %v2258_v22 = vmul.f32 0.25, %v2176_v21  ;;  %v3448_v23 = vpop.f32.mrb[19].mxu0  ;;  %v3453_v25 = vpop.f32.mrb[17].mxu1  ;;  %v3170_v21 = vld [vmem:[%s4599_s13 + $0x30] sm:$0xff] }
0x12de   :  { %v2260_v26 = vadd.f32 %v2258_v22, %v4254_v18  ;;  %v3171_v22 = vld [vmem:[%s4599_s13 + $0x38] sm:$0xff] }
0x12df   :  { %v2254_v27 = vpop.f32.mrb[20].mxu0  ;;  %v3605_v23 = vpack.c.bf16 %v3171_v22, %v3170_v21 }
0x12e0   :  { %v2259_v28 = vmul.f32 0.25, %v2254_v27  ;;  %v3458_v29 = vpop.f32.mrb[21].mxu0  ;;  %v2262_v5 = vsel %vm691_vm11, %v2260_v26, -inf }
0x12e1   :  { %2263 = vmax.xlane.f32.xlu1 %v2262_v5 }
0x12e2   :  { %v2261_v6 = vadd.f32 %v2259_v28, %v4257_v24 }
0x12e4   :  { %v2265_v30 = vsel %vm691_vm11, %v2261_v6, -inf }
0x12e5   :  { %2266 = vmax.xlane.f32.xlu0 %v2265_v30  ;;  %v3166_v30 = vld [vmem:[#allocation8 + $0x1] ss:$0 sm:$0xff] }
0x136e   :  { %v2264_v31 = vpop.xlane.xlu1 %2263 }
0x136f   :  { %v2268_v32 = vsub.f32 %v2260_v26, %v2264_v31 }
0x1371   :  { %v2270_v33 = vmul.f32 1.442695, %v2268_v32 }
0x1372   :  { %v2267_v34 = vpop.xlane.xlu0 %2266 }
0x1373   :  { %3703 = vpow2.f32 %v2270_v33  ;;  %v2269_v37 = vsub.f32 %v2261_v6, %v2267_v34  ;;  %v3167_v34 = vld [vmem:[#allocation10 + $0x1] ss:$0 sm:$0xff] }
0x1375   :  { %v2272_v38 = vmul.f32 1.442695, %v2269_v37 }
0x1377   :  { %3705 = vpow2.f32 %v2272_v38 }
0x137d   :  { %v3704_v18 = vpop.eup %3703 }
0x137e   :  { %v2274_v40 = vsel %vm691_vm11, %v3704_v18, 0.0 }
0x137f   :  { %2275 = vadd.xlane.f32.xlu0 %v2274_v40 }
0x1381   :  { %v3706_v42 = vpop.eup %3705 }
0x1382   :  { %v2277_v43 = vsel %vm691_vm11, %v3706_v42, 0.0 }
0x1383   :  { %2278 = vadd.xlane.f32.xlu1 %v2277_v43  ;;  %v3176_v43 = vld [vmem:[%s4601_s15 + $0x48] sm:$0xff] }
0x1394   :  { %2360 = vrot.lane.b32.xlu1 %v4416_v39, %s3930_s4  ;;  %v3143_v39 = vld [vmem:[%s4595_s9 + $0x30] sm:$0xff] }
0x1395   :  { %2284 = vrot.lane.b32.xlu0 %v4418_v41, %s3930_s4  ;;  %v3144_v41 = vld [vmem:[%s4595_s9 + $0x38] sm:$0xff] }
0x1396   :  { %v3593_v51 = vpack.c.bf16 %v3144_v41, %v3143_v39  ;;  %v3182_v39 = vld [vmem:[%s4601_s15 + $0x78] sm:$0xff] }
0x140c   :  { %v2276_v24 = vpop.xlane.xlu0 %2275 }
0x140d   :  { %3707 = vrcp.f32 %v2276_v24 }
0x1410   :  { %v2279_v44 = vpop.xlane.xlu1 %2278  ;;  %v2285_v45 = vpop.permute.xlu0 %2284 }
0x1411   :  { %3709 = vrcp.f32 %v2279_v44  ;;  %3460 = vmatpush3.msra.mxu1 %v2285_v45  ;;  %v3177_v44 = vld [vmem:[%s4601_s15 + $0x50] sm:$0xff]  ;;  %v3178_v45 = vld [vmem:[%s4601_s15 + $0x58] sm:$0xff] }
0x1412   :  { %3594 = vmatprep.subr.bf16.mxu1 %v3593_v51 }
0x1414   :  { %v2361_v46 = vpop.permute.xlu1 %2360 }
0x1415   :  { %3465 = vmatpush3.msra.mxu0 %v2361_v46  ;;  %v3613_v46 = vpack.c.bf16 %v3178_v45, %v3177_v44 }
0x1417   :  { %v3708_v47 = vpop.eup %3707 }
0x1418   :  { %v2282_v48 = vmul.f32 %v3708_v47, %v3704_v18  ;;  %v3179_v47 = vld [vmem:[%s4601_s15 + $0x60] sm:$0xff] }
0x141a   :  { %3462 = vmatmul.mubr.msk.f32.vlgmr.msra.gmra.mrb[18].mxu1 %vm691_vm11, %v2282_v48  ;;  %v3180_v48 = vld [vmem:[%s4601_s15 + $0x68] sm:$0xff] }
0x141b   :  { %v3710_v49 = vpop.eup %3709  ;;  %3596 = vmatpush3.bf16.msra.mxu1 %v3593_v51  ;;  %v3172_v51 = vld [vmem:[#allocation11 + $0x1] ss:$0 sm:$0xff] }
0x141c   :  { %v2283_v50 = vmul.f32 %v3710_v49, %v3706_v42  ;;  %3598 = vmatprep.subr.bf16.mxu1 %v3597_v54  ;;  %v3175_v42 = vld [vmem:[%s4601_s15 + $0x40] sm:$0xff]  ;;  %v3617_v49 = vpack.c.bf16 %v3180_v48, %v3179_v47  ;;  %v2912_v48 = vmul.u32 8, %v4168_v3 }
0x141d   :  { %v3609_v24 = vpack.c.bf16 %v3176_v43, %v3175_v42  ;;  %v3189_v43 = vld [vmem:[%s4603_s17 + $0x1] ss:$0 sm:$0xff] }
0x141e   :  { %3467 = vmatmul.mubr.msk.f32.vlgmr.msra.gmra.mrb[22].mxu0 %vm691_vm11, %v2283_v50  ;;  %v3181_v50 = vld [vmem:[%s4601_s15 + $0x70] sm:$0xff]  ;;  %vm2913_vm13 = vcmp.eq.s32.totalorder %v4166_v2, %v2912_v48 }
0x141f   :  { %v3621_v41 = vpack.c.bf16 %v3182_v39, %v3181_v50 }
0x14ed   :  { %v2356_v55 = vpop.f32.mrb[18].mxu1 }
0x14ee   :  { %v3463_v63 = vpop.f32.mrb[19].mxu1  ;;  %3473 = vmatprep.mubr.msk.f32.mxu1 %vm195_vm0, %v2356_v55 }
0x14f1   :  { %v2432_v61 = vpop.f32.mrb[22].mxu0 }
0x14f2   :  { %v3468_v56 = vpop.f32.mrb[23].mxu0  ;;  %3474 = vmatmul.mubr.msk.f32.vlgmr.msra.gmra.mrb[20].mxu1 %vm195_vm0, %v2432_v61 }
0x14f3   :  { %3600 = vmatpush3.bf16.msra.mxu1 %v3597_v54  ;;  %3480 = vmatprep.mubr.msk.f32.mxu1 %vm195_vm0, %v2022_v17 }
0x14f4   :  { %3610 = vmatprep.subr.bf16.mxu1 %v3609_v24 }
0x14fa   :  { %3481 = vmatmul.mubr.msk.f32.vlgmr.msra.gmra.mrb[20].mxu1 %vm195_vm0, %v2098_v20 }
0x14fb   :  { %3612 = vmatpush3.bf16.msra.mxu1 %v3609_v24 }
0x14fc   :  { %3614 = vmatprep.subr.bf16.mxu1 %v3613_v46 }
0x14ff   :  { %3616 = vmatpush3.bf16.msra.mxu1 %v3613_v46  ;;  %v3190_v46 = vld [vmem:[%s4604_s18 + $0x1] ss:$0 sm:$0xff] }
0x1500   :  { %3618 = vmatprep.subr.bf16.mxu1 %v3617_v49 }
0x1503   :  { %3620 = vmatpush3.bf16.msra.mxu1 %v3617_v49 }
0x1504   :  { %3622 = vmatprep.subr.bf16.mxu1 %v3621_v41 }
0x1507   :  { %3624 = vmatpush3.bf16.msra.mxu1 %v3621_v41  ;;  %v2989_v41 = vld [vmem:[#allocation13] sm:$0xff] }
0x15cd   :  { %v3482_v58 = vpop.f32.mrb[20].mxu1 }
0x15ce   :  { %v2605_v59 = vadd.f32 %v3482_v58, %v3165_v57  ;;  %v2589_v60 = vpop.f32.mrb[21].mxu1 }
0x15cf   :  { %v2604_v62 = vadd.f32 %v3165_v57, %v2589_v60 }
0x15d0   :  { %v2607_v0 = vadd.f32 %v2605_v59, %v4405_v36 }
0x15d1   :  { %v2606_v1 = vadd.f32 %v2604_v62, %v4403_v35  ;;  %v3168_v35 = vld [vmem:[%s4599_s13 + $0x20] sm:$0xff] }
0x15d2   :  { %v2615_v4 = vsel %vm372_vm9, %v2607_v0, 0.0  ;;  %v3601_v20 = vpack.c.bf16 %v3169_v19, %v3168_v35 }
0x15d3   :  { %2616 = vadd.xlane.f32.xlu0 %v2615_v4  ;;  %v2612_v7 = vsel %vm372_vm9, %v2606_v1, 0.0 }
0x15d4   :  { %2613 = vadd.xlane.f32.xlu1 %v2612_v7  ;;  %3602 = vmatprep.subr.bf16.mxu0 %v3601_v20 }
0x15d5   :  { %3604 = vmatpush3.bf16.msra.mxu0 %v3601_v20 }
0x15d6   :  { %3606 = vmatprep.subr.bf16.mxu0 %v3605_v23 }
0x15d9   :  { %3608 = vmatpush3.bf16.msra.mxu0 %v3605_v23 }
0x1660   :  { %v2617_v8 = vpop.xlane.xlu0 %2616 }
0x1661   :  { %v2619_v10 = vmul.f32 0.03125, %v2617_v8  ;;  %v2614_v11 = vpop.xlane.xlu1 %2613 }
0x1662   :  { %v2618_v12 = vmul.f32 0.03125, %v2614_v11 }
0x1663   :  { %v2621_v13 = vsub.f32 %v2607_v0, %v2619_v10 }
0x1664   :  { %v2620_v14 = vsub.f32 %v2606_v1, %v2618_v12 }
0x1665   :  { %v2623_v15 = vmul.f32 %v2621_v13, %v2621_v13 }
0x1666   :  { %v2622_v16 = vmul.f32 %v2620_v14, %v2620_v14 }
0x1667   :  { %v2627_v17 = vsel %vm372_vm9, %v2623_v15, 0.0  ;;  %v3184_v15 = vld [vmem:[%s4602_s16 + $0x1] ss:$0 sm:$0xff] }
0x1668   :  { %2628 = vadd.xlane.f32.xlu1 %v2627_v17  ;;  %v2624_v36 = vsel %vm372_vm9, %v2622_v16, 0.0 }
0x1669   :  { %2625 = vadd.xlane.f32.xlu0 %v2624_v36 }
0x16f5   :  { %v2629_v25 = vpop.xlane.xlu1 %2628 }
0x16f6   :  { %v2631_v26 = vmul.f32 0.03125, %v2629_v25  ;;  %v2626_v27 = vpop.xlane.xlu0 %2625 }
0x16f7   :  { %v2630_v28 = vmul.f32 0.03125, %v2626_v27 }
0x16f8   :  { %v2633_v29 = vadd.f32 1e-12, %v2631_v26 }
0x16f9   :  { %v2632_v5 = vadd.f32 1e-12, %v2630_v28 }
0x16fa   :  { %3711 = vrsqrt.f32 %v2633_v29 }
0x16fb   :  { %3713 = vrsqrt.f32 %v2632_v5 }
0x1704   :  { %v3712_v6 = vpop.eup %3711 }
0x1705   :  { %v3714_v31 = vpop.eup %3713  ;;  %v2637_v32 = vmul.f32 %v3712_v6, %v2621_v13 }
0x1706   :  { %v2636_v33 = vmul.f32 %v3714_v31, %v2620_v14 }
0x1707   :  { %v2645_v37 = vmul.f32 %v3166_v30, %v2637_v32  ;;  %v3931_v32 = vmov 0.0|0.0  }
0x1708   :  { %v2644_v38 = vmul.f32 %v3166_v30, %v2636_v33  ;;  %3625 = vmatprep.subr.bf16.mxu0 %v3931_v32 }
0x1709   :  { %v2653_v40 = vadd.f32 %v3167_v34, %v2645_v37 }
0x170a   :  { %v2652_v18 = vadd.f32 %v3167_v34, %v2644_v38 }
0x170c   :  { %3491 = vmatprep.mubr.msk.f32.mxu0 %vm372_vm9, %v2652_v18 }
0x170d   :  { %3492 = vmatmul.mubr.msk.f32.vlgmr.msra.gmra.mrb[24].mxu0 %vm372_vm9, %v2653_v40 }
0x170e   :  { %3517 = vmatprep.mubr.msk.f32.mxu0 %vm3925_vm10, %v3923_v9 }
0x17e0   :  { %v3493_v52 = vpop.f32.mrb[24].mxu0 }
0x17e1   :  { %v2745_v53 = vadd.f32 %v3493_v52, %v3172_v51  ;;  %v2739_v54 = vpop.f32.mrb[25].mxu0 }
0x17e2   :  { %v2740_v55 = vadd.f32 %v3172_v51, %v2739_v54  ;;  %v2990_v51 = vld [vmem:[#allocation13 + $0x8] sm:$0xff] }
0x17e3   :  { %v2751_v63 = vmul.f32 0.044715, %v2745_v53  ;;  %v2749_v12 = vmul.f32 0.5, %v2745_v53  ;;  %v3629_v54 = vpack.c.bf16 %v2990_v51, %v2989_v41 }
0x17e4   :  { %v2750_v61 = vmul.f32 0.044715, %v2740_v55  ;;  %v2748_v10 = vmul.f32 0.5, %v2740_v55 }
0x17e5   :  { %v2753_v56 = vmul.f32 %v2751_v63, %v2745_v53  ;;  %v2992_v63 = vld [vmem:[#allocation13 + $0x18] sm:$0xff] }
0x17e6   :  { %v2752_v57 = vmul.f32 %v2750_v61, %v2740_v55 }
0x17e7   :  { %v2755_v58 = vmul.f32 %v2753_v56, %v2745_v53  ;;  %v3193_v56 = vld [vmem:[%s4606_s20] ss:$0 sm:$0xff] }
0x17e8   :  { %v2754_v59 = vmul.f32 %v2752_v57, %v2740_v55 }
0x17e9   :  { %v2757_v60 = vadd.f32 %v2755_v58, %v2745_v53  ;;  %v3191_v53 = vsel %vm2913_vm13, 1.0, %v3923_v9 }
0x17ea   :  { %v2756_v62 = vadd.f32 %v2754_v59, %v2740_v55  ;;  %v2991_v55 = vld [vmem:[#allocation13 + $0x10] sm:$0xff] }
0x17eb   :  { %v2759_v0 = vmul.f32 0.7978846, %v2757_v60  ;;  %v3632_v61 = vpack.c.bf16 %v2992_v63, %v2991_v55 }
0x17ec   :  { %v2758_v1 = vmul.f32 0.7978846, %v2756_v62 }
0x17ed   :  { %3715 = vtanh.f32 %v2759_v0 }
0x17ee   :  { %3717 = vtanh.f32 %v2758_v1 }
0x17f7   :  { %v3716_v4 = vpop.eup %3715 }
0x17f8   :  { %v3718_v7 = vpop.eup %3717  ;;  %v2763_v8 = vadd.f32 1.0, %v3716_v4 }
0x17f9   :  { %v2762_v11 = vadd.f32 1.0, %v3718_v7 }
0x17fa   :  { %v2765_v14 = vmul.f32 %v2763_v8, %v2749_v12 }
0x17fb   :  { %v2764_v13 = vmul.f32 %v2762_v11, %v2748_v10 }
0x17fd   :  { %3510 = vmatprep.mubr.msk.f32.mxu1 %vm1541_vm12, %v2764_v13 }
0x17fe   :  { %3511 = vmatmul.mubr.msk.f32.vlgmr.msra.gmra.mrb[22].mxu1 %vm1541_vm12, %v2765_v14 }
0x18d1   :  { %v3512_v16 = vpop.f32.mrb[22].mxu1 }
0x18d2   :  { %v2861_v17 = vadd.f32 %v3512_v16, %v3184_v15  ;;  %v2855_v36 = vpop.f32.mrb[23].mxu1 }
0x18d3   :  { %v2856_v35 = vadd.f32 %v3184_v15, %v2855_v36 }
0x18d4   :  { %v2865_v19 = vadd.f32 %v2861_v17, %v2653_v40 }
0x18d5   :  { %v2864_v20 = vadd.f32 %v2856_v35, %v2652_v18 }
0x18d6   :  { %v2873_v21 = vsel %vm372_vm9, %v2865_v19, 0.0 }
0x18d7   :  { %2874 = vadd.xlane.f32.xlu1 %v2873_v21  ;;  %v2870_v22 = vsel %vm372_vm9, %v2864_v20, 0.0 }
0x18d8   :  { %2871 = vadd.xlane.f32.xlu0 %v2870_v22 }
0x1964   :  { %v2875_v23 = vpop.xlane.xlu1 %2874 }
0x1965   :  { %v2877_v25 = vmul.f32 0.03125, %v2875_v23  ;;  %v2872_v26 = vpop.xlane.xlu0 %2871 }
0x1966   :  { %v2876_v27 = vmul.f32 0.03125, %v2872_v26 }
0x1967   :  { %v2879_v28 = vsub.f32 %v2865_v19, %v2877_v25 }
0x1968   :  { %v2878_v29 = vsub.f32 %v2864_v20, %v2876_v27 }
0x1969   :  { %v2881_v5 = vmul.f32 %v2879_v28, %v2879_v28 }
0x196a   :  { %v2880_v6 = vmul.f32 %v2878_v29, %v2878_v29 }
0x196b   :  { %v2885_v30 = vsel %vm372_vm9, %v2881_v5, 0.0 }
0x196c   :  { %2886 = vadd.xlane.f32.xlu1 %v2885_v30  ;;  %v2882_v31 = vsel %vm372_vm9, %v2880_v6, 0.0 }
0x196d   :  { %2883 = vadd.xlane.f32.xlu0 %v2882_v31 }
0x19f9   :  { %v2887_v33 = vpop.xlane.xlu1 %2886 }
0x19fa   :  { %v2889_v34 = vmul.f32 0.03125, %v2887_v33  ;;  %v2884_v37 = vpop.xlane.xlu0 %2883 }
0x19fb   :  { %v2888_v38 = vmul.f32 0.03125, %v2884_v37 }
0x19fc   :  { %v2891_v18 = vadd.f32 1e-12, %v2889_v34 }
0x19fd   :  { %v2890_v40 = vadd.f32 1e-12, %v2888_v38 }
0x19fe   :  { %3719 = vrsqrt.f32 %v2891_v18 }
0x19ff   :  { %3721 = vrsqrt.f32 %v2890_v40 }
0x1a08   :  { %v3720_v42 = vpop.eup %3719 }
0x1a09   :  { %v3722_v24 = vpop.eup %3721  ;;  %v2895_v44 = vmul.f32 %v3720_v42, %v2879_v28 }
0x1a0a   :  { %v2894_v45 = vmul.f32 %v3722_v24, %v2878_v29 }
0x1a0b   :  { %v2903_v47 = vmul.f32 %v3189_v43, %v2895_v44 }
0x1a0c   :  { %v2902_v49 = vmul.f32 %v3189_v43, %v2894_v45 }
0x1a0d   :  { %v2911_v50 = vadd.f32 %v3190_v46, %v2903_v47 }
0x1a0e   :  { %v2910_v39 = vadd.f32 %v3190_v46, %v2902_v49 }
0x1a10   :  { %v3626_v52 = vpack.c.bf16 %v2911_v50, %v2910_v39 }
0x1a12   :  { %3627 = vmatpush3.bf16.msra.mxu0 %v3626_v52 }
0x1a13   :  { %3628 = vmatprep.subr.bf16.mxu0 %v3931_v32 }
0x1a15   :  { %3518 = vmatmul.mubr.msk.f32.vlgmr.msra.gmra.mrb[26].mxu0 %vm195_vm0, %v3191_v53 }
0x1a16   :  { %3630 = vmatpush3.bf16.msra.mxu0 %v3629_v54  ;;  %3528 = vmatprep.mubr.msk.f32.mxu0 %vm3925_vm10, %v3923_v9 }
0x1a17   :  { %3631 = vmatprep.subr.bf16.mxu0 %v3931_v32 }
0x1a1a   :  { %3633 = vmatpush3.bf16.msra.mxu0 %v3632_v61 }
0x1ae8   :  { %v2985_v2 = vpop.f32.mrb[26].mxu0 }
0x1ae9   :  { %v3519_v3 = vpop.f32.mrb[27].mxu0  ;;  %3529 = vmatmul.mubr.msk.f32.vlgmr.msra.gmra.mrb[28].mxu0 %vm372_vm9, %v2985_v2 }
0x1bbc   :  { %v3069_v57 = vpop.f32.mrb[28].mxu0 }
0x1bbd   :  { %v3070_v58 = vadd.f32 %v3193_v56, %v3069_v57  ;;  %v3530_v59 = vpop.f32.mrb[29].mxu0 }
0x1bbf   :  { %3723 = vtanh.f32 %v3070_v58 }
0x1bc9   :  { %v3724_v60 = vpop.eup %3723 }
0x1bca   :  { %3075 = vst.msk [vmem:[#allocation14] sm:$0x3] %vm3074_vm14, %v3724_v60 }
0x1bcb   :  { %3890 = shalt.err (!%p3887_p4)
}
0x1bcc   :  { %s4634_s20 = sld [smem:[#allocation26_spill]] }
0x1bd2   :  { %s3891_s29 = scalar_lea.hbm %s4634_s20, 32 }
0x1bd3   :  { %p3892_p5 = scmp.ne.s32.totalorder %s4634_s20, %s3891_s29  ;;  %p3895_p6 = scmp.lt.u32.totalorder %s3891_s29, %s4634_s20 }
0x1bd5   :  { %p3897_p7 = pnand %p3895_p6, %p3892_p5 }
0x1bd7   :  { %3900 = shalt.err (!%p3897_p7)
}
0x1bd8   :  { %3085 = dma.vmem_to_hbm [thread:$0]  %s3083_s25, 32, %s4634_s20, [#allocation4]  }
0x1bd9   :  { %3909 = dma.done.wait [#allocation4], 32  }
0x1bda   :  { %3910 = vsyncadd [#allocation4], 4294967264 }
0x1bdb   :  { %3089 = vsyncpa [#allocation3], 1 }
0x1bdc   :  { %3090 = vsyncpa [#allocation6], 1 }
0x1bdd   :  { %3091 = vsyncpa [#allocation9], 1 }
0x1bde   :  { %3092 = vsyncpa [#allocation12], 1 }
0x1bdf   :  { %3093 = vsyncpa [#allocation4], 1 }

</bundles_post_ra>
